<compile_context>
chip_gen: v6e
topology: v6e:2x2x1
jax: 0.10.0
libtpu: 0.0.40
codegen_flags: <defaults>
</compile_context>

<pallas_src>
import functools
import numpy as np
import jax
import jax.numpy as jnp
from jax.experimental import pallas as pl
from jax.experimental.pallas import tpu as pltpu

# ---- scaled-down LightCodeNetwork config (layers=4, hidden=32, skips=[2]) -------------
LAYERS    = 4
HID       = 32
HID2      = HID // 2                             # 16
N_EMB_XYZ = 4
N_EMB_DIR = 2
D_XYZ     = 3
D_DIR     = 3
C_XYZ     = D_XYZ * 2 * N_EMB_XYZ + D_XYZ        # 27 == in_channels_xyz
C_DIR     = D_DIR * 2 * N_EMB_DIR + D_DIR        # 15 == in_channels_dir
C_A       = 8                                    # in_channels_a
C_SPH     = 9                                    # in_channels_sph

# PosEmbedding(logscale=True) frequencies: exact powers of two
FREQS_XYZ = [float(2 ** k) for k in range(N_EMB_XYZ)]     # [1, 2, 4, 8]
FREQS_DIR = [float(2 ** k) for k in range(N_EMB_DIR)]     # [1, 2]

# packed input rows (channels on sublanes): [xyz(0:3) | dir(3:6) | a(6:14) | sph(14:23) | pad]
C_PACK = 24
ARG_G  = 8                          # one frequency group of sin/cos args: [xyz(3)|dir(3)|a0 a1(unused)]
C_ARGS = ARG_G * N_EMB_XYZ          # 32 argument rows (dir only uses the first 2 groups)
C_EMB  = C_PACK + 2 * C_ARGS        # 88 = [raw(24) | sin(32) | cos(32)]
OUT_C  = 8                          # output rows: [rgb(3) | shadow(1) | sigma(1) | pad(3)]

TN_DEFAULT = 2048                   # batch (lane) tile; sweep 1024-4096 per chip


def _round_up(v, m):
    return ((v + m - 1) // m) * m


def _cdiv(a, b):
    return -(-a // b)


def _choose_tiling(n, tile):
    """Lane-tile (multiple of 128) and padded batch; keeps >=2 grid steps when possible
    so both v7x TensorCores get work, while padding only to tile*num_tiles."""
    tile = max(128, int(tile))
    n_ceil = _round_up(max(n, 1), 128)
    num = _cdiv(n_ceil, tile)
    if num == 1 and n_ceil >= 256:
        num = 2
    tn = _round_up(_cdiv(n_ceil, num), 128)
    return tn, tn * num


# --------------------------------- Pallas kernel ---------------------------------------
def light_code_kernel(p_ref, wf, bfr, w1, b1, w2h, w3, b3,
                      wfs, bfs, wdsx, wd1, bd1, wd2, bd2, whead, bhead,
                      out_ref):
    p = p_ref[...]                                                    # (24, TN) f32

    # in-kernel positional-embedding arguments; 8-row frequency groups keep every
    # concatenate piece sublane-tile aligned (no relayout shuffles).  Rows 6,7 of each
    # group are unused (their weight columns are zero).
    p8 = p[0:ARG_G, :]                                                # [xyz(3) | dir(3) | a0 a1]
    args = jnp.concatenate([p8 * f for f in FREQS_XYZ], axis=0)       # (32, TN) f32, exact
    emb = jnp.concatenate([p, jnp.sin(args), jnp.cos(args)], axis=0)  # (88, TN) f32

    def mm(w_ref, x):                                                 # bf16 operands, f32 MXU accum
        return jax.lax.dot_general(
            w_ref[...], x.astype(jnp.bfloat16),
            (((1,), (0,)), ((), ())),
            preferred_element_type=jnp.float32)

    # fused front: [xyz_encoder_1 | xyz_encoder_3 emb-part | dir_a[0] raw | shadow[0] raw]
    front = mm(wf, emb) + bfr[...]                                    # (96, TN)

    h = jax.nn.relu(front[0:HID, :])                                  # xyz_encoder_1
    h = jax.nn.relu(mm(w1, h) + b1[...])                              # xyz_encoder_2
    h = jax.nn.relu(front[HID:2 * HID, :] + mm(w2h, h))               # xyz_encoder_3 (skip; b2 in bfr)
    h = jax.nn.relu(mm(w3, h) + b3[...])                              # xyz_encoder_4

    sf = mm(wfs, h) + bfs[...]                                        # (33, TN) = [xyz_final(32) | sigma(1)]
    xf = sf[0:HID, :]
    sigma = jax.nn.softplus(sf[HID:HID + 1, :])                       # (1, TN)

    ds = front[2 * HID:3 * HID, :] + mm(wdsx, xf)                     # (32, TN) = [dir_a[0](16) | shadow[0](16)]
    d = jax.nn.relu(ds[0:HID2, :])
    s = jax.nn.relu(ds[HID2:HID, :])
    d = jax.nn.relu(mm(wd1, d) + bd1[...])                            # dir_a_encoder[1]
    d = jax.nn.relu(mm(wd2, d) + bd2[...])                            # dir_a_encoder[2]

    # fused [static_rgb | shadow_layers[2]] head: one matmul, one sigmoid
    t = jnp.concatenate([d, s], axis=0)                               # (32, TN), 8-aligned pieces
    rgbsh = jax.nn.sigmoid(mm(whead, t) + bhead[...])                 # (4, TN) = [rgb(3) | shadow(1)]

    out_ref[0:4, :] = rgbsh
    out_ref[4:5, :] = sigma
    out_ref[5:OUT_C, :] = jnp.zeros((OUT_C - 5, p.shape[1]), jnp.float32)


# -------------------------- wrapper-side parameter packing -----------------------------
def init_params(key):
    """PyTorch-equivalent parameters (W stored (in_features, out_features), bias (1, out))."""
    def linear(k, fan_in, fan_out):
        kw, kb = jax.random.split(k)
        bound = 1.0 / np.sqrt(fan_in)
        w = jax.random.uniform(kw, (fan_in, fan_out), jnp.float32, -bound, bound)
        b = jax.random.uniform(kb, (1, fan_out), jnp.float32, -bound, bound)
        return w, b

    keys = jax.random.split(key, 12)
    p = {}
    p['w0'],   p['b0']   = linear(keys[0],  C_XYZ,              HID)   # xyz_encoder_1
    p['w1'],   p['b1']   = linear(keys[1],  HID,                HID)   # xyz_encoder_2
    p['w2'],   p['b2']   = linear(keys[2],  C_XYZ + HID,        HID)   # xyz_encoder_3 (skip)
    p['w3'],   p['b3']   = linear(keys[3],  HID,                HID)   # xyz_encoder_4
    p['wsig'], p['bsig'] = linear(keys[4],  HID,                1)     # static_sigma
    p['wfin'], p['bfin'] = linear(keys[5],  HID,                HID)   # xyz_encoder_final
    p['wd0'],  p['bd0']  = linear(keys[6],  HID + C_DIR + C_A,  HID2)  # dir_a_encoder[0]
    p['wd1'],  p['bd1']  = linear(keys[7],  HID2,               HID2)  # dir_a_encoder[1]
    p['wd2'],  p['bd2']  = linear(keys[8],  HID2,               HID2)  # dir_a_encoder[2]
    p['wrgb'], p['brgb'] = linear(keys[9],  HID2,               3)     # static_rgb
    p['ws0'],  p['bs0']  = linear(keys[10], HID + C_SPH,        HID2)  # shadow_layers[0]
    p['ws1'],  p['bs1']  = linear(keys[11], HID2,               1)     # shadow_layers[2]
    return p


def _emb_row_groups(n_freqs, d):
    """Index groups of a PosEmbedding-ordered axis: (identity, sin-by-freq, cos-by-freq)."""
    idx_sin, idx_cos = [], []
    for k in range(n_freqs):
        base = d + 2 * d * k
        idx_sin += list(range(base, base + d))
        idx_cos += list(range(base + d, base + 2 * d))
    return list(range(d)), idx_sin, idx_cos


def pack_params(p):
    """Reorder / fuse the PyTorch-layout weights into (out, in)-oriented kernel operands."""
    f32 = jnp.float32
    _, sx, cx = _emb_row_groups(N_EMB_XYZ, D_XYZ)
    _, sd, cd = _emb_row_groups(N_EMB_DIR, D_DIR)
    sx, cx, sd, cd = map(np.asarray, (sx, cx, sd, cd))

    w0t  = p['w0'].T        # (32, 27)
    w2t  = p['w2'].T        # (32, 59)   input order [xyz_emb(27) | h(32)]
    wd0t = p['wd0'].T       # (16, 55)   input order [xf(32) | dir_emb(15) | a(8)]
    ws0t = p['ws0'].T       # (16, 41)   input order [xf(32) | sph(9)]

    # fused front weight (96, 88)
    #   rows: [xyz_enc_1(32) | xyz_enc_3 emb-part(32) | dir_a_enc0 raw(16) | shadow0 raw(16)]
    #   cols: [packed p(24) | sin groups(32) | cos groups(32)]
    wf = jnp.zeros((3 * HID, C_EMB), f32)
    wf = wf.at[0:HID,                0:3].set(w0t[:, 0:3])                 # xyz identity
    wf = wf.at[HID:2 * HID,          0:3].set(w2t[:, 0:3])
    wf = wf.at[2 * HID:2 * HID + HID2, 3:6].set(wd0t[:, HID:HID + 3])      # dir identity
    wf = wf.at[2 * HID:2 * HID + HID2, 6:14].set(wd0t[:, HID + C_DIR:])    # a
    wf = wf.at[2 * HID + HID2:3 * HID, 14:23].set(ws0t[:, HID:])           # sph
    for k in range(N_EMB_XYZ):                                             # xyz sin/cos columns
        so = C_PACK + ARG_G * k
        co = C_PACK + C_ARGS + ARG_G * k
        wf = wf.at[0:HID,       so:so + 3].set(w0t[:, sx[3 * k:3 * k + 3]])
        wf = wf.at[HID:2 * HID, so:so + 3].set(w2t[:, sx[3 * k:3 * k + 3]])
        wf = wf.at[0:HID,       co:co + 3].set(w0t[:, cx[3 * k:3 * k + 3]])
        wf = wf.at[HID:2 * HID, co:co + 3].set(w2t[:, cx[3 * k:3 * k + 3]])
    for k in range(N_EMB_DIR):                                             # dir sin/cos columns
        so = C_PACK + ARG_G * k + 3
        co = C_PACK + C_ARGS + ARG_G * k + 3
        wf = wf.at[2 * HID:2 * HID + HID2, so:so + 3].set(wd0t[:, HID + sd[3 * k:3 * k + 3]])
        wf = wf.at[2 * HID:2 * HID + HID2, co:co + 3].set(wd0t[:, HID + cd[3 * k:3 * k + 3]])
    bfr = jnp.concatenate([p['b0'], p['b2'], p['bd0'], p['bs0']], axis=1).T   # (96, 1)

    w2h  = w2t[:, C_XYZ:]                                                     # (32, 32)
    wfs  = jnp.concatenate([p['wfin'].T, p['wsig'].T], axis=0)                # (33, 32)
    bfs  = jnp.concatenate([p['bfin'], p['bsig']], axis=1).T                  # (33, 1)
    wdsx = jnp.concatenate([wd0t[:, 0:HID], ws0t[:, 0:HID]], axis=0)          # (32, 32)

    whead = jnp.zeros((4, HID), f32)                                          # [rgb(3) | shadow(1)]
    whead = whead.at[0:3, 0:HID2].set(p['wrgb'].T)
    whead = whead.at[3:4, HID2:HID].set(p['ws1'].T)
    bhead = jnp.concatenate([p['brgb'], p['bs1']], axis=1).T                  # (4, 1)

    c = lambda w: w.astype(jnp.bfloat16)        # matmul operands bf16, biases stay f32
    return (c(wf), bfr,
            c(p['w1'].T), p['b1'].T, c(w2h), c(p['w3'].T), p['b3'].T,
            c(wfs), bfs, c(wdsx),
            c(p['wd1'].T), p['bd1'].T, c(p['wd2'].T), p['bd2'].T,
            c(whead), bhead)


def pack_inputs(input_xyz, views, input_a, input_sph, n_pad):
    """Single narrow (C, N) pack: rows [xyz | dir | a | sph | pad], batch on lanes.
    Batch padding is part of the same pack — no separate pad op, no frequency expansion."""
    cols = jnp.concatenate(
        [input_xyz.astype(jnp.float32), views.astype(jnp.float32),
         input_a.astype(jnp.float32), input_sph.astype(jnp.float32)], axis=-1)   # (n, 23)
    n = cols.shape[0]
    cols = jnp.pad(cols, ((0, n_pad - n), (0, C_PACK - cols.shape[1])))
    return cols.T                                                                 # (24, n_pad)


# ------------------------------------ forward ------------------------------------------
@functools.partial(jax.jit, static_argnames=("tile",))
def light_code_forward(params, input_xyz, views, input_a, input_sph, *, tile=TN_DEFAULT):
    n = input_xyz.shape[0]
    tn, n_pad = _choose_tiling(n, tile)

    packed  = pack_inputs(input_xyz, views, input_a, input_sph, n_pad)   # (24, n_pad)
    weights = pack_params(params)

    in_specs = [pl.BlockSpec((C_PACK, tn), lambda i: (0, i))]
    # constant index_map -> each weight is DMA'd once and stays resident in VMEM
    in_specs += [pl.BlockSpec(w.shape, lambda i: (0, 0)) for w in weights]

    out = pl.pallas_call(
        light_code_kernel,
        out_shape=jax.ShapeDtypeStruct((OUT_C, n_pad), jnp.float32),
        grid=(n_pad // tn,),
        in_specs=in_specs,
        out_specs=pl.BlockSpec((OUT_C, tn), lambda i: (0, i)),
        compiler_params=pltpu.CompilerParams(
            dimension_semantics=("parallel",),          # megacore / v7x 2-TC sharding
            vmem_limit_bytes=32 * 1024 * 1024),         # > v5e's 16 MiB scoped default
    )(packed, *weights)

    rgb    = out[0:3, :n].T
    shadow = jnp.tile(out[3:4, :n].T, (1, 3))           # == shadow.repeat(..., 3)
    sigma  = out[4:5, :n].T
    return sigma, rgb, shadow


# -------------------------------- pure-JAX reference -----------------------------------
def pos_embed(x, freqs):
    out = [x]
    for f in freqs:
        out.append(jnp.sin(f * x))
        out.append(jnp.cos(f * x))
    return jnp.concatenate(out, axis=-1)


def reference(p, input_xyz, views, input_a, input_sph):
    """LightCodeNetwork forward with the same mixed precision as the kernel
    (bf16 matmul operands, f32 accumulation, f32 elementwise)."""
    def mm(a, w):
        return jax.lax.dot_general(a.astype(jnp.bfloat16), w.astype(jnp.bfloat16),
                                   (((1,), (0,)), ((), ())),
                                   preferred_element_type=jnp.float32)

    xyz = pos_embed(input_xyz, FREQS_XYZ)
    dira = jnp.concatenate([pos_embed(views, FREQS_DIR), input_a], -1)
    h = jax.nn.relu(mm(xyz, p['w0']) + p['b0'])
    h = jax.nn.relu(mm(h, p['w1']) + p['b1'])
    h = jax.nn.relu(mm(jnp.concatenate([xyz, h], -1), p['w2']) + p['b2'])
    h = jax.nn.relu(mm(h, p['w3']) + p['b3'])
    sigma = jax.nn.softplus(mm(h, p['wsig']) + p['bsig'])
    xf = mm(h, p['wfin']) + p['bfin']
    d = jnp.concatenate([xf, dira], -1)
    d = jax.nn.relu(mm(d, p['wd0']) + p['bd0'])
    d = jax.nn.relu(mm(d, p['wd1']) + p['bd1'])
    d = jax.nn.relu(mm(d, p['wd2']) + p['bd2'])
    rgb = jax.nn.sigmoid(mm(d, p['wrgb']) + p['brgb'])
    s = jax.nn.relu(mm(jnp.concatenate([xf, input_sph], -1), p['ws0']) + p['bs0'])
    s = jax.nn.sigmoid(mm(s, p['ws1']) + p['bs1'])
    return sigma, rgb, jnp.tile(s, (1, 3))


if __name__ == "__main__":
    key = jax.random.PRNGKey(0)
    kp, kx, kv, ka, ks = jax.random.split(key, 5)
    params = init_params(kp)

    N = 300   # small demo batch (not a tile multiple -> exercises padding + 2-step grid)
    input_xyz = jax.random.normal(kx, (N, D_XYZ), jnp.float32)
    views     = jax.random.normal(kv, (N, D_DIR), jnp.float32)
    input_a   = jax.random.normal(ka, (N, C_A),   jnp.float32)
    input_sph = jax.random.normal(ks, (N, C_SPH), jnp.float32)

    r_sigma, r_rgb, r_shadow = reference(params, input_xyz, views, input_a, input_sph)

    def check(outs):
        sigma, rgb, shadow = outs
        np.testing.assert_allclose(np.asarray(sigma),  np.asarray(r_sigma),  atol=1e-2, rtol=1e-2)
        np.testing.assert_allclose(np.asarray(rgb),    np.asarray(r_rgb),    atol=1e-2, rtol=1e-2)
        np.testing.assert_allclose(np.asarray(shadow), np.asarray(r_shadow), atol=1e-2, rtol=1e-2)

    # default configuration: tile auto-shrunk to 256 lanes -> 2 "parallel" grid steps
    check(jax.block_until_ready(
        light_code_forward(params, input_xyz, views, input_a, input_sph)))

    # small tile: exercises the multi-step grid + resident-weight path
    check(jax.block_until_ready(
        light_code_forward(params, input_xyz, views, input_a, input_sph, tile=128)))

    print("KERNEL_OK")
</pallas_src>

<mosaic_0001>
module attributes {stable_mosaic.version = 11 : i64} {
  func.func @light_code_kernel(%arg0: i32, %arg1: memref<24x256xf32, #tpu.memory_space<vmem>>, %arg2: memref<96x88xbf16, #tpu.memory_space<vmem>>, %arg3: memref<96x1xf32, #tpu.memory_space<vmem>>, %arg4: memref<32x32xbf16, #tpu.memory_space<vmem>>, %arg5: memref<32x1xf32, #tpu.memory_space<vmem>>, %arg6: memref<32x32xbf16, #tpu.memory_space<vmem>>, %arg7: memref<32x32xbf16, #tpu.memory_space<vmem>>, %arg8: memref<32x1xf32, #tpu.memory_space<vmem>>, %arg9: memref<33x32xbf16, #tpu.memory_space<vmem>>, %arg10: memref<33x1xf32, #tpu.memory_space<vmem>>, %arg11: memref<32x32xbf16, #tpu.memory_space<vmem>>, %arg12: memref<16x16xbf16, #tpu.memory_space<vmem>>, %arg13: memref<16x1xf32, #tpu.memory_space<vmem>>, %arg14: memref<16x16xbf16, #tpu.memory_space<vmem>>, %arg15: memref<16x1xf32, #tpu.memory_space<vmem>>, %arg16: memref<4x32xbf16, #tpu.memory_space<vmem>>, %arg17: memref<4x1xf32, #tpu.memory_space<vmem>>, %arg18: memref<8x256xf32, #tpu.memory_space<vmem>>) attributes {dimension_semantics = [#tpu.dimension_semantics<parallel>], iteration_bounds = array<i64: 2>, scalar_prefetch = 0 : i64, scratch_operands = 0 : i64, tpu.core_type = #tpu.core_type<tc>, window_params = [{transform_indices = @transform_0, window_bounds = array<i64: 24, 256>}, {pipeline_mode = #tpu.pipeline_mode<synchronous>, transform_indices = @transform_1, window_bounds = array<i64: 96, 88>}, {pipeline_mode = #tpu.pipeline_mode<synchronous>, transform_indices = @transform_2, window_bounds = array<i64: 96, 1>}, {pipeline_mode = #tpu.pipeline_mode<synchronous>, transform_indices = @transform_3, window_bounds = array<i64: 32, 32>}, {pipeline_mode = #tpu.pipeline_mode<synchronous>, transform_indices = @transform_4, window_bounds = array<i64: 32, 1>}, {pipeline_mode = #tpu.pipeline_mode<synchronous>, transform_indices = @transform_5, window_bounds = array<i64: 32, 32>}, {pipeline_mode = #tpu.pipeline_mode<synchronous>, transform_indices = @transform_6, window_bounds = array<i64: 32, 32>}, {pipeline_mode = #tpu.pipeline_mode<synchronous>, transform_indices = @transform_7, window_bounds = array<i64: 32, 1>}, {pipeline_mode = #tpu.pipeline_mode<synchronous>, transform_indices = @transform_8, window_bounds = array<i64: 33, 32>}, {pipeline_mode = #tpu.pipeline_mode<synchronous>, transform_indices = @transform_9, window_bounds = array<i64: 33, 1>}, {pipeline_mode = #tpu.pipeline_mode<synchronous>, transform_indices = @transform_10, window_bounds = array<i64: 32, 32>}, {pipeline_mode = #tpu.pipeline_mode<synchronous>, transform_indices = @transform_11, window_bounds = array<i64: 16, 16>}, {pipeline_mode = #tpu.pipeline_mode<synchronous>, transform_indices = @transform_12, window_bounds = array<i64: 16, 1>}, {pipeline_mode = #tpu.pipeline_mode<synchronous>, transform_indices = @transform_13, window_bounds = array<i64: 16, 16>}, {pipeline_mode = #tpu.pipeline_mode<synchronous>, transform_indices = @transform_14, window_bounds = array<i64: 16, 1>}, {pipeline_mode = #tpu.pipeline_mode<synchronous>, transform_indices = @transform_15, window_bounds = array<i64: 4, 32>}, {pipeline_mode = #tpu.pipeline_mode<synchronous>, transform_indices = @transform_16, window_bounds = array<i64: 4, 1>}, {transform_indices = @transform_17, window_bounds = array<i64: 8, 256>}]} {
    %c0 = arith.constant 0 : index
    %c0_0 = arith.constant 0 : index
    %0 = vector.load %arg1[%c0, %c0_0] : memref<24x256xf32, #tpu.memory_space<vmem>>, vector<24x256xf32>
    %1 = vector.extract_strided_slice %0 {offsets = [0, 0], sizes = [8, 256], strides = [1, 1]} : vector<24x256xf32> to vector<8x256xf32>
    %cst = arith.constant 1.000000e+00 : f32
    %2 = vector.broadcast %cst : f32 to vector<8x256xf32>
    %3 = arith.mulf %1, %2 : vector<8x256xf32>
    %cst_1 = arith.constant 2.000000e+00 : f32
    %4 = vector.broadcast %cst_1 : f32 to vector<8x256xf32>
    %5 = arith.mulf %1, %4 : vector<8x256xf32>
    %cst_2 = arith.constant 4.000000e+00 : f32
    %6 = vector.broadcast %cst_2 : f32 to vector<8x256xf32>
    %7 = arith.mulf %1, %6 : vector<8x256xf32>
    %cst_3 = arith.constant 8.000000e+00 : f32
    %8 = vector.broadcast %cst_3 : f32 to vector<8x256xf32>
    %9 = arith.mulf %1, %8 : vector<8x256xf32>
    %10 = tpu.concatenate %3, %5, %7, %9 in 0 : vector<8x256xf32>, vector<8x256xf32>, vector<8x256xf32>, vector<8x256xf32> -> vector<32x256xf32>
    %11 = math.sin %10 : vector<32x256xf32>
    %12 = math.cos %10 : vector<32x256xf32>
    %13 = tpu.concatenate %0, %11, %12 in 0 : vector<24x256xf32>, vector<32x256xf32>, vector<32x256xf32> -> vector<88x256xf32>
    %c0_4 = arith.constant 0 : index
    %c0_5 = arith.constant 0 : index
    %14 = vector.load %arg2[%c0_4, %c0_5] : memref<96x88xbf16, #tpu.memory_space<vmem>>, vector<96x88xbf16>
    %15 = arith.truncf %13 : vector<88x256xf32> to vector<88x256xbf16>
    %cst_6 = arith.constant dense<0.000000e+00> : vector<96x256xf32>
    %16 = tpu.matmul %14, %15, %cst_6 {dimension_numbers = #tpu.dot_dimension_numbers<[1], [0], [0], [1], [0, 0, 1, 1], [], []>} : vector<96x88xbf16>, vector<88x256xbf16>, vector<96x256xf32> -> vector<96x256xf32>
    %c0_7 = arith.constant 0 : index
    %c0_8 = arith.constant 0 : index
    %17 = vector.load %arg3[%c0_7, %c0_8] : memref<96x1xf32, #tpu.memory_space<vmem>>, vector<96x1xf32>
    %18 = vector.broadcast %17 : vector<96x1xf32> to vector<96x256xf32>
    %19 = arith.addf %16, %18 : vector<96x256xf32>
    %20 = vector.extract_strided_slice %19 {offsets = [0, 0], sizes = [32, 256], strides = [1, 1]} : vector<96x256xf32> to vector<32x256xf32>
    %cst_9 = arith.constant 0.000000e+00 : f32
    %21 = vector.broadcast %cst_9 : f32 to vector<32x256xf32>
    %22 = arith.maximumf %20, %21 : vector<32x256xf32>
    %c0_10 = arith.constant 0 : index
    %c0_11 = arith.constant 0 : index
    %23 = vector.load %arg4[%c0_10, %c0_11] : memref<32x32xbf16, #tpu.memory_space<vmem>>, vector<32x32xbf16>
    %24 = arith.truncf %22 : vector<32x256xf32> to vector<32x256xbf16>
    %cst_12 = arith.constant dense<0.000000e+00> : vector<32x256xf32>
    %25 = tpu.matmul %23, %24, %cst_12 {dimension_numbers = #tpu.dot_dimension_numbers<[1], [0], [0], [1], [0, 0, 1, 1], [], []>} : vector<32x32xbf16>, vector<32x256xbf16>, vector<32x256xf32> -> vector<32x256xf32>
    %c0_13 = arith.constant 0 : index
    %c0_14 = arith.constant 0 : index
    %26 = vector.load %arg5[%c0_13, %c0_14] : memref<32x1xf32, #tpu.memory_space<vmem>>, vector<32x1xf32>
    %27 = vector.broadcast %26 : vector<32x1xf32> to vector<32x256xf32>
    %28 = arith.addf %25, %27 : vector<32x256xf32>
    %cst_15 = arith.constant 0.000000e+00 : f32
    %29 = vector.broadcast %cst_15 : f32 to vector<32x256xf32>
    %30 = arith.maximumf %28, %29 : vector<32x256xf32>
    %31 = vector.extract_strided_slice %19 {offsets = [32, 0], sizes = [32, 256], strides = [1, 1]} : vector<96x256xf32> to vector<32x256xf32>
    %c0_16 = arith.constant 0 : index
    %c0_17 = arith.constant 0 : index
    %32 = vector.load %arg6[%c0_16, %c0_17] : memref<32x32xbf16, #tpu.memory_space<vmem>>, vector<32x32xbf16>
    %33 = arith.truncf %30 : vector<32x256xf32> to vector<32x256xbf16>
    %cst_18 = arith.constant dense<0.000000e+00> : vector<32x256xf32>
    %34 = tpu.matmul %32, %33, %cst_18 {dimension_numbers = #tpu.dot_dimension_numbers<[1], [0], [0], [1], [0, 0, 1, 1], [], []>} : vector<32x32xbf16>, vector<32x256xbf16>, vector<32x256xf32> -> vector<32x256xf32>
    %35 = arith.addf %31, %34 : vector<32x256xf32>
    %cst_19 = arith.constant 0.000000e+00 : f32
    %36 = vector.broadcast %cst_19 : f32 to vector<32x256xf32>
    %37 = arith.maximumf %35, %36 : vector<32x256xf32>
    %c0_20 = arith.constant 0 : index
    %c0_21 = arith.constant 0 : index
    %38 = vector.load %arg7[%c0_20, %c0_21] : memref<32x32xbf16, #tpu.memory_space<vmem>>, vector<32x32xbf16>
    %39 = arith.truncf %37 : vector<32x256xf32> to vector<32x256xbf16>
    %cst_22 = arith.constant dense<0.000000e+00> : vector<32x256xf32>
    %40 = tpu.matmul %38, %39, %cst_22 {dimension_numbers = #tpu.dot_dimension_numbers<[1], [0], [0], [1], [0, 0, 1, 1], [], []>} : vector<32x32xbf16>, vector<32x256xbf16>, vector<32x256xf32> -> vector<32x256xf32>
    %c0_23 = arith.constant 0 : index
    %c0_24 = arith.constant 0 : index
    %41 = vector.load %arg8[%c0_23, %c0_24] : memref<32x1xf32, #tpu.memory_space<vmem>>, vector<32x1xf32>
    %42 = vector.broadcast %41 : vector<32x1xf32> to vector<32x256xf32>
    %43 = arith.addf %40, %42 : vector<32x256xf32>
    %cst_25 = arith.constant 0.000000e+00 : f32
    %44 = vector.broadcast %cst_25 : f32 to vector<32x256xf32>
    %45 = arith.maximumf %43, %44 : vector<32x256xf32>
    %c0_26 = arith.constant 0 : index
    %c0_27 = arith.constant 0 : index
    %46 = vector.load %arg9[%c0_26, %c0_27] : memref<33x32xbf16, #tpu.memory_space<vmem>>, vector<33x32xbf16>
    %47 = arith.truncf %45 : vector<32x256xf32> to vector<32x256xbf16>
    %cst_28 = arith.constant dense<0.000000e+00> : vector<33x256xf32>
    %48 = tpu.matmul %46, %47, %cst_28 {dimension_numbers = #tpu.dot_dimension_numbers<[1], [0], [0], [1], [0, 0, 1, 1], [], []>} : vector<33x32xbf16>, vector<32x256xbf16>, vector<33x256xf32> -> vector<33x256xf32>
    %c0_29 = arith.constant 0 : index
    %c0_30 = arith.constant 0 : index
    %49 = vector.load %arg10[%c0_29, %c0_30] : memref<33x1xf32, #tpu.memory_space<vmem>>, vector<33x1xf32>
    %50 = vector.broadcast %49 : vector<33x1xf32> to vector<33x256xf32>
    %51 = arith.addf %48, %50 : vector<33x256xf32>
    %52 = vector.extract_strided_slice %51 {offsets = [0, 0], sizes = [32, 256], strides = [1, 1]} : vector<33x256xf32> to vector<32x256xf32>
    %53 = vector.extract_strided_slice %51 {offsets = [32, 0], sizes = [1, 256], strides = [1, 1]} : vector<33x256xf32> to vector<1x256xf32>
    %cst_31 = arith.constant 0.000000e+00 : f32
    %54 = vector.broadcast %cst_31 : f32 to vector<1x256xf32>
    %55 = arith.maximumf %53, %54 : vector<1x256xf32>
    %56 = vector.broadcast %cst_31 : f32 to vector<1x256xf32>
    %57 = arith.subf %53, %56 : vector<1x256xf32>
    %58 = arith.cmpf one, %57, %57 : vector<1x256xf32>
    %59 = vector.broadcast %cst_31 : f32 to vector<1x256xf32>
    %60 = arith.addf %53, %59 : vector<1x256xf32>
    %61 = math.absf %57 : vector<1x256xf32>
    %cst_32 = arith.constant 0.000000e+00 : f32
    %62 = vector.broadcast %cst_32 : f32 to vector<1x256xf32>
    %63 = arith.subf %62, %61 : vector<1x256xf32>
    %64 = math.exp %63 : vector<1x256xf32>
    %65 = math.log1p %64 : vector<1x256xf32>
    %66 = arith.addf %55, %65 : vector<1x256xf32>
    %67 = arith.select %58, %60, %66 : vector<1x256xi1>, vector<1x256xf32>
    %68 = vector.extract_strided_slice %19 {offsets = [64, 0], sizes = [32, 256], strides = [1, 1]} : vector<96x256xf32> to vector<32x256xf32>
    %c0_33 = arith.constant 0 : index
    %c0_34 = arith.constant 0 : index
    %69 = vector.load %arg11[%c0_33, %c0_34] : memref<32x32xbf16, #tpu.memory_space<vmem>>, vector<32x32xbf16>
    %70 = arith.truncf %52 : vector<32x256xf32> to vector<32x256xbf16>
    %cst_35 = arith.constant dense<0.000000e+00> : vector<32x256xf32>
    %71 = tpu.matmul %69, %70, %cst_35 {dimension_numbers = #tpu.dot_dimension_numbers<[1], [0], [0], [1], [0, 0, 1, 1], [], []>} : vector<32x32xbf16>, vector<32x256xbf16>, vector<32x256xf32> -> vector<32x256xf32>
    %72 = arith.addf %68, %71 : vector<32x256xf32>
    %73 = vector.extract_strided_slice %72 {offsets = [0, 0], sizes = [16, 256], strides = [1, 1]} : vector<32x256xf32> to vector<16x256xf32>
    %cst_36 = arith.constant 0.000000e+00 : f32
    %74 = vector.broadcast %cst_36 : f32 to vector<16x256xf32>
    %75 = arith.maximumf %73, %74 : vector<16x256xf32>
    %76 = vector.extract_strided_slice %72 {offsets = [16, 0], sizes = [16, 256], strides = [1, 1]} : vector<32x256xf32> to vector<16x256xf32>
    %cst_37 = arith.constant 0.000000e+00 : f32
    %77 = vector.broadcast %cst_37 : f32 to vector<16x256xf32>
    %78 = arith.maximumf %76, %77 : vector<16x256xf32>
    %c0_38 = arith.constant 0 : index
    %c0_39 = arith.constant 0 : index
    %79 = vector.load %arg12[%c0_38, %c0_39] : memref<16x16xbf16, #tpu.memory_space<vmem>>, vector<16x16xbf16>
    %80 = arith.truncf %75 : vector<16x256xf32> to vector<16x256xbf16>
    %cst_40 = arith.constant dense<0.000000e+00> : vector<16x256xf32>
    %81 = tpu.matmul %79, %80, %cst_40 {dimension_numbers = #tpu.dot_dimension_numbers<[1], [0], [0], [1], [0, 0, 1, 1], [], []>} : vector<16x16xbf16>, vector<16x256xbf16>, vector<16x256xf32> -> vector<16x256xf32>
    %c0_41 = arith.constant 0 : index
    %c0_42 = arith.constant 0 : index
    %82 = vector.load %arg13[%c0_41, %c0_42] : memref<16x1xf32, #tpu.memory_space<vmem>>, vector<16x1xf32>
    %83 = vector.broadcast %82 : vector<16x1xf32> to vector<16x256xf32>
    %84 = arith.addf %81, %83 : vector<16x256xf32>
    %cst_43 = arith.constant 0.000000e+00 : f32
    %85 = vector.broadcast %cst_43 : f32 to vector<16x256xf32>
    %86 = arith.maximumf %84, %85 : vector<16x256xf32>
    %c0_44 = arith.constant 0 : index
    %c0_45 = arith.constant 0 : index
    %87 = vector.load %arg14[%c0_44, %c0_45] : memref<16x16xbf16, #tpu.memory_space<vmem>>, vector<16x16xbf16>
    %88 = arith.truncf %86 : vector<16x256xf32> to vector<16x256xbf16>
    %cst_46 = arith.constant dense<0.000000e+00> : vector<16x256xf32>
    %89 = tpu.matmul %87, %88, %cst_46 {dimension_numbers = #tpu.dot_dimension_numbers<[1], [0], [0], [1], [0, 0, 1, 1], [], []>} : vector<16x16xbf16>, vector<16x256xbf16>, vector<16x256xf32> -> vector<16x256xf32>
    %c0_47 = arith.constant 0 : index
    %c0_48 = arith.constant 0 : index
    %90 = vector.load %arg15[%c0_47, %c0_48] : memref<16x1xf32, #tpu.memory_space<vmem>>, vector<16x1xf32>
    %91 = vector.broadcast %90 : vector<16x1xf32> to vector<16x256xf32>
    %92 = arith.addf %89, %91 : vector<16x256xf32>
    %cst_49 = arith.constant 0.000000e+00 : f32
    %93 = vector.broadcast %cst_49 : f32 to vector<16x256xf32>
    %94 = arith.maximumf %92, %93 : vector<16x256xf32>
    %95 = tpu.concatenate %94, %78 in 0 : vector<16x256xf32>, vector<16x256xf32> -> vector<32x256xf32>
    %c0_50 = arith.constant 0 : index
    %c0_51 = arith.constant 0 : index
    %96 = vector.load %arg16[%c0_50, %c0_51] : memref<4x32xbf16, #tpu.memory_space<vmem>>, vector<4x32xbf16>
    %97 = arith.truncf %95 : vector<32x256xf32> to vector<32x256xbf16>
    %cst_52 = arith.constant dense<0.000000e+00> : vector<4x256xf32>
    %98 = tpu.matmul %96, %97, %cst_52 {dimension_numbers = #tpu.dot_dimension_numbers<[1], [0], [0], [1], [0, 0, 1, 1], [], []>} : vector<4x32xbf16>, vector<32x256xbf16>, vector<4x256xf32> -> vector<4x256xf32>
    %c0_53 = arith.constant 0 : index
    %c0_54 = arith.constant 0 : index
    %99 = vector.load %arg17[%c0_53, %c0_54] : memref<4x1xf32, #tpu.memory_space<vmem>>, vector<4x1xf32>
    %100 = vector.broadcast %99 : vector<4x1xf32> to vector<4x256xf32>
    %101 = arith.addf %98, %100 : vector<4x256xf32>
    %102 = arith.negf %101 : vector<4x256xf32>
    %103 = math.exp %102 : vector<4x256xf32>
    %cst_55 = arith.constant 1.000000e+00 : f32
    %104 = vector.broadcast %cst_55 : f32 to vector<4x256xf32>
    %105 = arith.addf %104, %103 : vector<4x256xf32>
    %106 = arith.divf %104, %105 : vector<4x256xf32>
    %c0_56 = arith.constant 0 : index
    %c0_57 = arith.constant 0 : index
    %107 = vector.load %arg18[%c0_56, %c0_57] : memref<8x256xf32, #tpu.memory_space<vmem>>, vector<4x256xf32>
    tpu.vector_store %arg18[%c0_56, %c0_57], %106 {strides = array<i32>} : memref<8x256xf32, #tpu.memory_space<vmem>>, vector<4x256xf32>,
    %c4 = arith.constant 4 : index
    %c0_58 = arith.constant 0 : index
    %108 = vector.load %arg18[%c4, %c0_58] : memref<8x256xf32, #tpu.memory_space<vmem>>, vector<1x256xf32>
    tpu.vector_store %arg18[%c4, %c0_58], %67 {strides = array<i32>} : memref<8x256xf32, #tpu.memory_space<vmem>>, vector<1x256xf32>,
    %cst_59 = arith.constant 0.000000e+00 : f32
    %109 = vector.broadcast %cst_59 : f32 to vector<3x256xf32>
    %c5 = arith.constant 5 : index
    %c0_60 = arith.constant 0 : index
    %110 = vector.load %arg18[%c5, %c0_60] : memref<8x256xf32, #tpu.memory_space<vmem>>, vector<3x256xf32>
    tpu.vector_store %arg18[%c5, %c0_60], %109 {strides = array<i32>} : memref<8x256xf32, #tpu.memory_space<vmem>>, vector<3x256xf32>,
    return
  }
  func.func @transform_0(%arg0: i32) -> (i32, i32) {
    %c0_i32 = arith.constant 0 : i32
    %c0_i32_0 = arith.constant 0 : i32
    return %c0_i32, %arg0 : i32, i32
  }
  func.func @transform_1(%arg0: i32) -> (i32, i32) {
    %c0_i32 = arith.constant 0 : i32
    %c0_i32_0 = arith.constant 0 : i32
    %c0_i32_1 = arith.constant 0 : i32
    return %c0_i32, %c0_i32_0 : i32, i32
  }
  func.func @transform_2(%arg0: i32) -> (i32, i32) {
    %c0_i32 = arith.constant 0 : i32
    %c0_i32_0 = arith.constant 0 : i32
    %c0_i32_1 = arith.constant 0 : i32
    return %c0_i32, %c0_i32_0 : i32, i32
  }
  func.func @transform_3(%arg0: i32) -> (i32, i32) {
    %c0_i32 = arith.constant 0 : i32
    %c0_i32_0 = arith.constant 0 : i32
    %c0_i32_1 = arith.constant 0 : i32
    return %c0_i32, %c0_i32_0 : i32, i32
  }
  func.func @transform_4(%arg0: i32) -> (i32, i32) {
    %c0_i32 = arith.constant 0 : i32
    %c0_i32_0 = arith.constant 0 : i32
    %c0_i32_1 = arith.constant 0 : i32
    return %c0_i32, %c0_i32_0 : i32, i32
  }
  func.func @transform_5(%arg0: i32) -> (i32, i32) {
    %c0_i32 = arith.constant 0 : i32
    %c0_i32_0 = arith.constant 0 : i32
    %c0_i32_1 = arith.constant 0 : i32
    return %c0_i32, %c0_i32_0 : i32, i32
  }
  func.func @transform_6(%arg0: i32) -> (i32, i32) {
    %c0_i32 = arith.constant 0 : i32
    %c0_i32_0 = arith.constant 0 : i32
    %c0_i32_1 = arith.constant 0 : i32
    return %c0_i32, %c0_i32_0 : i32, i32
  }
  func.func @transform_7(%arg0: i32) -> (i32, i32) {
    %c0_i32 = arith.constant 0 : i32
    %c0_i32_0 = arith.constant 0 : i32
    %c0_i32_1 = arith.constant 0 : i32
    return %c0_i32, %c0_i32_0 : i32, i32
  }
  func.func @transform_8(%arg0: i32) -> (i32, i32) {
    %c0_i32 = arith.constant 0 : i32
    %c0_i32_0 = arith.constant 0 : i32
    %c0_i32_1 = arith.constant 0 : i32
    return %c0_i32, %c0_i32_0 : i32, i32
  }
  func.func @transform_9(%arg0: i32) -> (i32, i32) {
    %c0_i32 = arith.constant 0 : i32
    %c0_i32_0 = arith.constant 0 : i32
    %c0_i32_1 = arith.constant 0 : i32
    return %c0_i32, %c0_i32_0 : i32, i32
  }
  func.func @transform_10(%arg0: i32) -> (i32, i32) {
    %c0_i32 = arith.constant 0 : i32
    %c0_i32_0 = arith.constant 0 : i32
    %c0_i32_1 = arith.constant 0 : i32
    return %c0_i32, %c0_i32_0 : i32, i32
  }
  func.func @transform_11(%arg0: i32) -> (i32, i32) {
    %c0_i32 = arith.constant 0 : i32
    %c0_i32_0 = arith.constant 0 : i32
    %c0_i32_1 = arith.constant 0 : i32
    return %c0_i32, %c0_i32_0 : i32, i32
  }
  func.func @transform_12(%arg0: i32) -> (i32, i32) {
    %c0_i32 = arith.constant 0 : i32
    %c0_i32_0 = arith.constant 0 : i32
    %c0_i32_1 = arith.constant 0 : i32
    return %c0_i32, %c0_i32_0 : i32, i32
  }
  func.func @transform_13(%arg0: i32) -> (i32, i32) {
    %c0_i32 = arith.constant 0 : i32
    %c0_i32_0 = arith.constant 0 : i32
    %c0_i32_1 = arith.constant 0 : i32
    return %c0_i32, %c0_i32_0 : i32, i32
  }
  func.func @transform_14(%arg0: i32) -> (i32, i32) {
    %c0_i32 = arith.constant 0 : i32
    %c0_i32_0 = arith.constant 0 : i32
    %c0_i32_1 = arith.constant 0 : i32
    return %c0_i32, %c0_i32_0 : i32, i32
  }
  func.func @transform_15(%arg0: i32) -> (i32, i32) {
    %c0_i32 = arith.constant 0 : i32
    %c0_i32_0 = arith.constant 0 : i32
    %c0_i32_1 = arith.constant 0 : i32
    return %c0_i32, %c0_i32_0 : i32, i32
  }
  func.func @transform_16(%arg0: i32) -> (i32, i32) {
    %c0_i32 = arith.constant 0 : i32
    %c0_i32_0 = arith.constant 0 : i32
    %c0_i32_1 = arith.constant 0 : i32
    return %c0_i32, %c0_i32_0 : i32, i32
  }
  func.func @transform_17(%arg0: i32) -> (i32, i32) {
    %c0_i32 = arith.constant 0 : i32
    %c0_i32_0 = arith.constant 0 : i32
    return %c0_i32, %arg0 : i32, i32
  }
}

</mosaic_0001>

<bundles_post_ra>
// kernel: light_code_forward.1
= control target key start
LH: loop header
LB: loop body
LE: loop exit
PB: predicated region body
PF: predicated region fallthrough
CT: control target
= control target key end

     0   :  { %s4853_s0 = inlined_call_operand.vmem [shape: f32[24,512], index: 0, kind: input, shape index: {}]   ;;  %s4854_s1 = inlined_call_operand.vmem [shape: bf16[96,88], index: 1, kind: input, shape index: {}]   ;;  %s4855_s2 = inlined_call_operand.vmem [shape: f32[96,1], index: 2, kind: input, shape index: {}]   ;;  %s4856_s3 = inlined_call_operand.vmem [shape: bf16[32,32], index: 3, kind: input, shape index: {}]   ;;  %s4857_s4 = inlined_call_operand.vmem [shape: f32[32,1], index: 4, kind: input, shape index: {}]   ;;  %s4858_s5 = inlined_call_operand.vmem [shape: bf16[32,32], index: 5, kind: input, shape index: {}]   ;;  %s4859_s6 = inlined_call_operand.vmem [shape: bf16[32,32], index: 6, kind: input, shape index: {}]   ;;  %s4860_s7 = inlined_call_operand.vmem [shape: f32[32,1], index: 7, kind: input, shape index: {}]   ;;  %s4861_s8 = inlined_call_operand.vmem [shape: bf16[33,32], index: 8, kind: input, shape index: {}]   ;;  %s4862_s9 = inlined_call_operand.vmem [shape: f32[33,1], index: 9, kind: input, shape index: {}]   ;;  %s4863_s10 = inlined_call_operand.vmem [shape: bf16[32,32], index: 10, kind: input, shape index: {}]   ;;  %s4864_s11 = inlined_call_operand.vmem [shape: bf16[16,16], index: 11, kind: input, shape index: {}]   ;;  %s4865_s12 = inlined_call_operand.vmem [shape: f32[16,1], index: 12, kind: input, shape index: {}]   ;;  %s4866_s13 = inlined_call_operand.vmem [shape: bf16[16,16], index: 13, kind: input, shape index: {}]   ;;  %s4867_s14 = inlined_call_operand.vmem [shape: f32[16,1], index: 14, kind: input, shape index: {}]   ;;  %s4868_s15 = inlined_call_operand.vmem [shape: bf16[4,32], index: 15, kind: input, shape index: {}]   ;;  %s4869_s16 = inlined_call_operand.vmem [shape: f32[4,1], index: 16, kind: input, shape index: {}]   ;;  %s4870_s17 = inlined_call_operand.vmem [shape: f32[8,512], index: 17, kind: output, shape index: {}]  }
   0x1   :  { %4872 = sst [smem:[#allocation3_spill]] %s4853_s0 }
   0x2   :  { %4873 = sst [smem:[#allocation4_spill]] %s4854_s1 }
   0x3   :  { %s3747_s24 = smov 0   ;;  %s3749_s25 = smov 0  }
   0x4   :  { %s3751_s26 = smov 0  }
   0x5 LB: > { %s3367_s27 = sadd.s32 4294967295, %s3646_s26   ;;  %s3764_s28 = sadd.s32 1, %s3646_s26   ;;  %s3646_s26 = sphi %s3751_s26, %s4894_s26   ;;  %s3642_s25 = sphi %s3749_s25, %s4893_s25   ;;  %s3638_s24 = sphi %s3747_s24, %s4892_s24  }
   0x6   : > { %s31_s29 = ssub.s32 %s3646_s26, %s3764_s28  ;;  %s34_s0 = sadd.s32 1, %s3642_s25 }
   0x7   : > { %p32_p0 = scmp.eq.s32.totalorder %s31_s29, 0  ;;  %p41_p1 = scmp.ne.s32.totalorder %s3642_s25, %s3638_s24 }
   0x8   : > { %p42_p2 = scmp.eq.s32.totalorder %s3646_s26, 0  ;;  %p3370_p4 = scmp.ge.s32.totalorder %s3646_s26, 2 }
   0x9   : > { %s3773_s30 = scalar_select %p32_p0, %s3642_s25, %s34_s0  }
   0xa   : > { %p43_p3 = por %p42_p2, %p41_p1  ;;  %477 = sbr.rel (%p3370_p4) target bundleno = 28 (0x1c), region = 80 }
   0xf   : > { %480 = sbr.rel (!%p43_p3) target bundleno = 28 (0x1c), region = 84  ;;  %s482_s18 = sand.u32 (%p43_p3), 1, %s3642_s25  }
  0x10   : > { %s3485_s19 = sshll.u32 (%p43_p3), %s3646_s26, 4  ;;  %s3486_s1 = smul.u32 (%p43_p3), 48, %s482_s18 }
  0x11   : > { %s4874_s22 = sld [smem:[#allocation3_spill]] (%p43_p3) }
  0x12   : > { %s484_s29 = scalar_lea.vmem (%p43_p3), [#allocation2], %s3486_s1 }
  0x17   : > { %s487_s23 = scalar_lea.vmem %s4874_s22, %s3485_s19 }
  0x18   : > { %v500_v0 = vld [vmem:[%s487_s23] sm:$0xff]  ;;  %v502_v1 = vld [vmem:[%s487_s23 + $0x8] sm:$0xff] }
  0x19   : > { %v504_v2 = vld [vmem:[%s487_s23 + $0x20] sm:$0xff]  ;;  %v506_v3 = vld [vmem:[%s487_s23 + $0x28] sm:$0xff]  ;;  %501 = vst [vmem:[%s484_s29] sm:$0xff] %v500_v0  ;;  %503 = vst [vmem:[%s484_s29 + $0x8] sm:$0xff] %v502_v1 }
  0x1a   : > { %v508_v4 = vld [vmem:[%s487_s23 + $0x40] sm:$0xff]  ;;  %v510_v5 = vld [vmem:[%s487_s23 + $0x48] sm:$0xff]  ;;  %505 = vst [vmem:[%s484_s29 + $0x10] sm:$0xff] %v504_v2  ;;  %507 = vst [vmem:[%s484_s29 + $0x18] sm:$0xff] %v506_v3 }
  0x1b   : > { %509 = vst [vmem:[%s484_s29 + $0x20] sm:$0xff] %v508_v4  ;;  %511 = vst [vmem:[%s484_s29 + $0x28] sm:$0xff] %v510_v5 }
  0x1c PF: > { %p3373_p5 = scmp.ge.s32.totalorder %s3646_s26, 1  ;;  %p516_p6 = scmp.lt.s32.totalorder %s3646_s26, 3 }
  0x1e   : > { %p517_p7 = pnand %p3373_p5, %p516_p6 }
  0x1f   : > { %s523_s0 = sand.u32 (!%p517_p7), 1, %s3638_s24   ;;  %s4891_s22 = sld [smem:[#allocation4_spill]] (!%p517_p7) }
  0x20   : > { %520 = sbr.rel (%p517_p7) target bundleno = 2263 (0x8d7), region = 107  ;;  %s3374_s24 = sshll.u32 (!%p517_p7), %s3367_s27, 1 }
  0x21   : > { %s3487_s18 = smul.u32 (!%p517_p7), 48, %s523_s0  ;;  %p576_p8 = scmp.lt.s32.totalorder (!%p517_p7), %s3374_s24, 3 }
  0x23   : > { %s3784_s19 = scalar_lea.vmem (!%p517_p7), [#allocation2], %s3487_s18 }
  0x25   : > { %v3787_v6 = vld [vmem:[%s3784_s19 + $0x8] sm:$0xff]  ;;  %v3790_v7 = vld [vmem:[%s3784_s19] sm:$0xff]  ;;  %v3648_v41 = vmov 683565275   ;;  %v3649_v43 = vmov 2475754826  }
  0x26   : > { %v3793_v8 = vmul.f32 8.0, %v3787_v6  ;;  %v3796_v9 = vmul.f32 8.0, %v3790_v7  ;;  %v3799_v10 = vmul.f32 2.0, %v3787_v6  ;;  %v3812_v30 = vmul.f32 4.0, %v3787_v6  ;;  %s4896_s24 = smov (!%p576_p8, %s3374_s24), 3 }
  0x27   : > { %v3650_v45 = vmov 2131351028   ;;  %v3651_v47 = vmov 2102212464   ;;  %v3652_v49 = vmov 920167782  }
  0x28   : > { %v1322_v11 = vand.u32 2147483647, %v3793_v8  ;;  %v1325_v12 = vand.u32 2139095040, %v3793_v8  ;;  %v1218_v13 = vand.u32 2147483647, %v3796_v9  ;;  %v1221_v14 = vand.u32 2139095040, %v3796_v9 }
  0x29   : > { %v909_v19 = vand.u32 2139095040, %v3799_v10  ;;  %v906_v22 = vand.u32 2147483647, %v3799_v10  ;;  %v3653_v56 = vmov 1326507024   ;;  %vm1324_vm13 = vcmp.lt.s32.totalorder %v3793_v8, 0 }
  0x2a   : > { %v1326_v15 = vshrl.u32 %v1325_v12, 23  ;;  %v1329_v16 = vand.u32 8388607, %v1322_v11  ;;  %v1222_v17 = vshrl.u32 %v1221_v14, 23  ;;  %v1225_v18 = vand.u32 8388607, %v1218_v13 }
  0x2b   : > { %v910_v23 = vshrl.u32 %v909_v19, 23  ;;  %v3816_v31 = vand.u32 8388607, %v906_v22  ;;  %vm3918_vm14 = vcmp.le.f32.partialorder %v1322_v11, 0.7853982  ;;  %s3375_s1 = sshll.u32 %s4896_s24, 3 }
  0x2c   : > { %v3404_v20 = vadd.s32 4294967169, %v1326_v15  ;;  %v3400_v21 = vadd.s32 4294967169, %v1222_v17  ;;  %v1330_v24 = vor.u32 8388608, %v1329_v16  ;;  %v1226_v26 = vor.u32 8388608, %v1225_v18 }
  0x2d   : > { %v3388_v28 = vadd.s32 4294967169, %v910_v23 }
  0x2e   : > { %v1332_v25 = vadd.s32 1, %v3404_v20  ;;  %v1228_v27 = vadd.s32 1, %v3400_v21  ;;  %v3818_v34 = vshll.u32 %v1330_v24, 8  ;;  %v3822_v38 = vshll.u32 %v1226_v26, 8 }
  0x2f   : > { %v3824_v39 = vadd.s32 1, %v3388_v28 }
  0x30   : > { %vm1333_vm0 = vcmp.gt.s32.totalorder %v1332_v25, 0  ;;  %vm1229_vm1 = vcmp.gt.s32.totalorder %v1228_v27, 0 }
  0x31   : > { %v1334_v29 = vsel %vm1333_vm0, %v1332_v25, 0  ;;  %v1230_v35 = vsel %vm1229_vm1, %v1228_v27, 0  ;;  %vm917_vm6 = vcmp.gt.s32.totalorder %v3824_v39, 0 }
  0x32   : > { %v1335_v32 = vshrl.u32 %v1334_v29, 5  ;;  %v1336_v33 = vand.u32 31, %v1334_v29  ;;  %v3820_v36 = vshrl.u32 %v1230_v35, 5  ;;  %v1232_v37 = vand.u32 31, %v1230_v35 }
  0x34   : > { %v1337_v40 = vsub.s32 32, %v1336_v33  ;;  %v1339_v42 = vshll.u32 %v3648_v41, %v1336_v33  ;;  %v1342_v44 = vshll.u32 %v3649_v43, %v1336_v33  ;;  %v1345_v46 = vshll.u32 %v3650_v45, %v1336_v33 }
  0x35   : > { %v1348_v48 = vshll.u32 %v3651_v47, %v1336_v33  ;;  %v1351_v50 = vshll.u32 %v3652_v49, %v1336_v33  ;;  %vm1354_vm2 = vcmp.lt.s32.totalorder %v1335_v32, 1  ;;  %vm1355_vm3 = vcmp.lt.s32.totalorder %v1335_v32, 2 }
  0x36   : > { %v1338_v51 = vshrl.u32 %v3648_v41, %v1337_v40  ;;  %v1340_v52 = vshrl.u32 %v3649_v43, %v1337_v40  ;;  %v1343_v53 = vshrl.u32 %v3650_v45, %v1337_v40  ;;  %v1346_v54 = vshrl.u32 %v3651_v47, %v1337_v40 }
  0x37   : > { %v1349_v55 = vshrl.u32 %v3652_v49, %v1337_v40  ;;  %v1352_v57 = vshrl.u32 %v3653_v56, %v1337_v40  ;;  %vm1356_vm4 = vcmp.lt.s32.totalorder %v1335_v32, 3  ;;  %vm1357_vm5 = vcmp.lt.s32.totalorder %v1335_v32, 4 }
  0x38   : > { %v1341_v58 = vor.u32 %v1340_v52, %v1339_v42  ;;  %v1344_v59 = vor.u32 %v1343_v53, %v1342_v44  ;;  %v1347_v60 = vor.u32 %v1346_v54, %v1345_v46  ;;  %v1233_v61 = vsub.s32 32, %v1232_v37 }
  0x39   : > { %v1350_v62 = vor.u32 %v1349_v55, %v1348_v48  ;;  %v1353_v63 = vor.u32 %v1352_v57, %v1351_v50  ;;  %v1235_v0 = vshll.u32 %v3648_v41, %v1232_v37  ;;  %v1238_v15 = vshll.u32 %v3649_v43, %v1232_v37 }
  0x3a   : > { %v1358_v1 = vsel %vm1354_vm2, %v1338_v51, %v1341_v58  ;;  %v1359_v2 = vsel %vm1357_vm5, %v1347_v60, 2102212464  ;;  %v1362_v3 = vsel %vm1354_vm2, %v1341_v58, %v1344_v59  ;;  %v1366_v4 = vsel %vm1354_vm2, %v1344_v59, %v1347_v60 }
  0x3b   : > { %v1360_v5 = vsel %vm1356_vm4, %v1344_v59, %v1359_v2  ;;  %v1363_v12 = vsel %vm1357_vm5, %v1350_v62, 920167782  ;;  %v1367_v14 = vsel %vm1357_vm5, %v1353_v63, 1326507024  ;;  %v1234_v18 = vshrl.u32 %v3648_v41, %v1233_v61 }
  0x3c   : > { %v1364_v16 = vsel %vm1356_vm4, %v1347_v60, %v1363_v12  ;;  %v1368_v17 = vsel %vm1356_vm4, %v1350_v62, %v1367_v14  ;;  %v1236_v19 = vshrl.u32 %v3649_v43, %v1233_v61  ;;  %v1361_v20 = vsel %vm1355_vm3, %v1358_v1, %v1360_v5 }
  0x3d   : > { %v1365_v21 = vsel %vm1355_vm3, %v1362_v3, %v1364_v16  ;;  %v1369_v23 = vsel %vm1355_vm3, %v1366_v4, %v1368_v17  ;;  %v1239_v24 = vshrl.u32 %v3650_v45, %v1233_v61  ;;  %v1241_v35 = vshll.u32 %v3650_v45, %v1232_v37 }
  0x3e   : > { %v3853_v25 = vmul.u32.u64.low %v3818_v34, %v1369_v23  ;;  %v3854_v26 = vmul.u32.u64.high %v3818_v34, %v1369_v23, %v3853_v25  ;;  %v3857_v27 = vmul.u32.u64.low %v3818_v34, %v1365_v21  ;;  %v3858_v28 = vmul.u32.u64.high %v3818_v34, %v1365_v21, %v3857_v27 }
  0x3f   : > { %v1237_v29 = vor.u32 %v1236_v19, %v1235_v0  ;;  %v1240_v33 = vor.u32 %v1239_v24, %v1238_v15  ;;  %v1242_v40 = vshrl.u32 %v3651_v47, %v1233_v61  ;;  %v1244_v42 = vshll.u32 %v3651_v47, %v1232_v37 }
  0x40   : > { %v1245_v32 = vshrl.u32 %v3652_v49, %v1233_v61  ;;  %v1247_v44 = vshll.u32 %v3652_v49, %v1232_v37  ;;  %v1248_v46 = vshrl.u32 %v3653_v56, %v1233_v61  ;;  %v1377_v48 = vmul.u32 %v3818_v34, %v1361_v20 }
  0x41   : > { %v1243_v50 = vor.u32 %v1242_v40, %v1241_v35  ;;  %vm1250_vm7 = vcmp.lt.s32.totalorder %v3820_v36, 1  ;;  %vm1251_vm8 = vcmp.lt.s32.totalorder %v3820_v36, 2  ;;  %vm1379_vm9 = vc.u32 %v3854_v26, %v3857_v27 }
  0x42   : > { %v1380_v51 = vadd.s32 1, %v3858_v28  ;;  %v1246_v52 = vor.u32 %v1245_v32, %v1244_v42  ;;  %vm1252_vm10 = vcmp.lt.s32.totalorder %v3820_v36, 3  ;;  %v1249_v53 = vor.u32 %v1248_v46, %v1247_v44 }
  0x43   : > { %vm1253_vm11 = vcmp.lt.s32.totalorder %v3820_v36, 4  ;;  %v1254_v37 = vsel %vm1250_vm7, %v1234_v18, %v1237_v29  ;;  %v1258_v54 = vsel %vm1250_vm7, %v1237_v29, %v1240_v33  ;;  %v1262_v58 = vsel %vm1250_vm7, %v1240_v33, %v1243_v50 }
  0x44   : > { %v1381_v55 = vsel %vm1379_vm9, %v1380_v51, %v3858_v28  ;;  %v1255_v34 = vsel %vm1253_vm11, %v1243_v50, 2102212464  ;;  %v1259_v57 = vsel %vm1253_vm11, %v1246_v52, 920167782  ;;  %v1263_v62 = vsel %vm1253_vm11, %v1249_v53, 1326507024 }
  0x45   : > { %v1382_v59 = vadd.s32 %v1381_v55, %v1377_v48  ;;  %v1256_v60 = vsel %vm1252_vm10, %v1240_v33, %v1255_v34  ;;  %v1260_v61 = vsel %vm1252_vm10, %v1243_v50, %v1259_v57  ;;  %v1264_v1 = vsel %vm1252_vm10, %v1246_v52, %v1263_v62 }
  0x46   : > { %v1257_v63 = vsel %vm1251_vm8, %v1254_v37, %v1256_v60  ;;  %v1261_v0 = vsel %vm1251_vm8, %v1258_v54, %v1260_v61  ;;  %v918_v2 = vsel %vm917_vm6, %v3824_v39, 0  ;;  %v1265_v4 = vsel %vm1251_vm8, %v1262_v58, %v1264_v1 }
  0x47   : > { %v1383_v3 = vadd.s32 536870912, %v1382_v59  ;;  %v3884_v5 = vmul.u32.u64.low %v3822_v38, %v1261_v0  ;;  %v3885_v12 = vmul.u32.u64.high %v3822_v38, %v1261_v0, %v3884_v5  ;;  %v1117_v16 = vand.u32 2139095040, %v3812_v30 }
  0x48   : > { %v3889_v14 = vmul.u32.u64.low %v3822_v38, %v1265_v4  ;;  %v3890_v15 = vmul.u32.u64.high %v3822_v38, %v1265_v4, %v3889_v14  ;;  %v920_v18 = vand.u32 31, %v918_v2  ;;  %v1273_v19 = vmul.u32 %v3822_v38, %v1257_v63 }
  0x49   : > { %v1384_v17 = vshrl.u32 %v1383_v3, 30  ;;  %v1114_v39 = vand.u32 2147483647, %v3812_v30  ;;  %v1276_v36 = vadd.s32 1, %v3885_v12  ;;  %v914_v21 = vor.u32 8388608, %v3816_v31 }
  0x4a   : > { %vm1275_vm12 = vc.u32 %v3890_v15, %v3884_v5  ;;  %v1118_v23 = vshrl.u32 %v1117_v16, 23  ;;  %v921_v28 = vsub.s32 32, %v920_v18  ;;  %v3907_v33 = vmul.f32 2.0, %v3790_v7 }
  0x4b   : > { %v1385_v20 = vshll.u32 %v1384_v17, 30  ;;  %v1277_v25 = vsel %vm1275_vm12, %v1276_v36, %v3885_v12  ;;  %v3904_v38 = vand.u32 8388607, %v1114_v39  ;;  %v3911_v35 = vshll.u32 %v914_v21, 8 }
  0x4c   : > { %v1278_v29 = vadd.s32 %v1277_v25, %v1273_v19  ;;  %v3914_v40 = vmul.f32 4.0, %v3790_v7  ;;  %v1378_v32 = vadd.s32 %v3857_v27, %v3854_v26  ;;  %v3923_v46 = vshrl.u32 %v918_v2, 5 }
  0x4d   : > { %v3899_v24 = vsub.s32 %v1382_v59, %v1385_v20  ;;  %v3925_v48 = vadd.s32 4294967169, %v1118_v23  ;;  %v1408_v51 = vsub.s32 4, %v1384_v17  ;;  %v929_v52 = vshll.u32 %v3650_v45, %v920_v18 }
  0x4e   : > { %v1279_v44 = vadd.s32 536870912, %v1278_v29  ;;  %v930_v7 = vshrl.u32 %v3651_v47, %v921_v28  ;;  %v923_v11 = vshll.u32 %v3648_v41, %v920_v18  ;;  %v924_v37 = vshrl.u32 %v3649_v43, %v921_v28 }
  0x4f   : > { %v1388_v31 = vsub.s32 0, %v3899_v24  ;;  %v1122_v26 = vor.u32 8388608, %v3904_v38  ;;  %v926_v54 = vshll.u32 %v3649_v43, %v920_v18  ;;  %v927_v55 = vshrl.u32 %v3650_v45, %v921_v28 }
  0x50   : > { %v3930_v53 = vshrl.u32 %v1279_v44, 30  ;;  %v932_v34 = vshll.u32 %v3651_v47, %v920_v18  ;;  %v933_v58 = vshrl.u32 %v3652_v49, %v921_v28  ;;  %vm938_vm15 = vcmp.lt.s32.totalorder %v3923_v46, 1 }
  0x51   : > { %v3405_v50 = vmin.u32 %v1388_v31, %v3899_v24  ;;  %vm941_vm0 = vcmp.lt.s32.totalorder %v3923_v46, 4  ;;  %v1409_v60 = vsel %vm1324_vm13, %v1408_v51, %v1384_v17  ;;  %v922_v61 = vshrl.u32 %v3648_v41, %v921_v28 }
  0x52   : > { %v1281_v57 = vshll.u32 %v3930_v53, 30  ;;  %v931_v62 = vor.u32 %v930_v7, %v929_v52  ;;  %v925_v0 = vor.u32 %v924_v37, %v923_v11  ;;  %v935_v1 = vshll.u32 %v3652_v49, %v920_v18 }
  0x53   : > { %v1390_v27 = vclz %v3405_v50  ;;  %v936_v2 = vshrl.u32 %v3653_v56, %v921_v28  ;;  %v928_v3 = vor.u32 %v927_v55, %v926_v54  ;;  %v934_v4 = vor.u32 %v933_v58, %v932_v34 }
  0x54   : > { %v3945_v63 = vsub.s32 %v1278_v29, %v1281_v57  ;;  %v943_v12 = vsel %vm941_vm0, %v931_v62, 2102212464  ;;  %vm939_vm2 = vcmp.lt.s32.totalorder %v3923_v46, 2  ;;  %vm940_vm3 = vcmp.lt.s32.totalorder %v3923_v46, 3 }
  0x55   : > { %v3406_v59 = vadd.s32 4294967294, %v1390_v27  ;;  %v1411_v18 = vsel %vm3918_vm14, 0, %v1409_v60  ;;  %vm1220_vm4 = vcmp.lt.s32.totalorder %v3796_v9, 0  ;;  %v937_v21 = vor.u32 %v936_v2, %v935_v1 }
  0x56   : > { %v1284_v16 = vsub.s32 0, %v3945_v63  ;;  %v942_v23 = vsel %vm938_vm15, %v922_v61, %v925_v0  ;;  %v944_v25 = vsel %vm940_vm3, %v928_v3, %v943_v12  ;;  %v947_v31 = vsel %vm941_vm0, %v934_v4, 920167782 }
  0x57   : > { %vm3407_vm1 = vcmp.lt.s32.totalorder %v3406_v59, 0  ;;  %v1415_v44 = vadd.s32 3, %v1411_v18  ;;  %v1274_v50 = vadd.s32 %v3884_v5, %v3890_v15  ;;  %v1304_v52 = vsub.s32 4, %v3930_v53 }
  0x58   : > { %v1393_v14 = vsel %vm3407_vm1, 0, %v3406_v59  ;;  %v3401_v36 = vmin.u32 %v1284_v16, %v3945_v63  ;;  %vm3972_vm5 = vcmp.le.f32.partialorder %v1218_v13, 0.7853982  ;;  %v948_v37 = vsel %vm940_vm3, %v931_v62, %v947_v31 }
  0x59   : > { %v1394_v17 = vsub.s32 32, %v1393_v14  ;;  %v1395_v19 = vshll.u32 %v3899_v24, %v1393_v14  ;;  %v1398_v20 = vsub.s32 4294967266, %v1393_v14  ;;  %v946_v24 = vsel %vm938_vm15, %v925_v0, %v928_v3 }
  0x5a   : > { %v1286_v51 = vclz %v3401_v36  ;;  %v950_v27 = vsel %vm938_vm15, %v928_v3, %v931_v62  ;;  %v945_v5 = vsel %vm939_vm2, %v942_v23, %v944_v25  ;;  %v949_v15 = vsel %vm939_vm2, %v946_v24, %v948_v37 }
  0x5b   : > { %v1396_v28 = vshrl.u32 %v1378_v32, %v1394_v17  ;;  %v1399_v29 = vadd.s32 127, %v1398_v20  ;;  %v951_v55 = vsel %vm941_vm0, %v937_v21, 1326507024  ;;  %v1124_v58 = vadd.s32 1, %v3925_v48 }
  0x5c   : > { %v3402_v54 = vadd.s32 4294967294, %v1286_v51  ;;  %v952_v57 = vsel %vm940_vm3, %v934_v4, %v951_v55  ;;  %v3992_v60 = vmul.u32.u64.low %v3911_v35, %v949_v15  ;;  %v3993_v61 = vmul.u32.u64.high %v3911_v35, %v949_v15, %v3992_v60 }
  0x5d   : > { %v1397_v7 = vor.u32 %v1396_v28, %v1395_v19  ;;  %v1400_v11 = vshll.u32 %v1399_v29, 23  ;;  %v953_v59 = vsel %vm939_vm2, %v950_v27, %v952_v57  ;;  %vm1125_vm7 = vcmp.gt.s32.totalorder %v1124_v58, 0 }
  0x5e   : > { %vm3403_vm6 = vcmp.lt.s32.totalorder %v3402_v54, 0  ;;  %v3997_v1 = vmul.u32.u64.low %v3911_v35, %v953_v59  ;;  %v3998_v2 = vmul.u32.u64.high %v3911_v35, %v953_v59, %v3997_v1  ;;  %v1305_v46 = vsel %vm1220_vm4, %v1304_v52, %v3930_v53 }
  0x5f   : > { %v1401_v13 = vor.u32 4788187, %v1400_v11  ;;  %v1404_v34 = vcvt.s32.f32 %v1397_v7  ;;  %v1289_v0 = vsel %vm3403_vm6, 0, %v3402_v54  ;;  %v961_v14 = vmul.u32 %v3911_v35, %v945_v5 }
  0x60   : > { %v1290_v3 = vsub.s32 32, %v1289_v0  ;;  %v1291_v4 = vshll.u32 %v3945_v63, %v1289_v0  ;;  %v1294_v12 = vsub.s32 4294967266, %v1289_v0  ;;  %v1126_v16 = vsel %vm1125_vm7, %v1124_v58, 0 }
  0x61   : > { %v1402_v62 = vand.u32 2147483647, %v1401_v13  ;;  %v4005_v17 = vand.u32 3, %v1411_v18  ;;  %v964_v36 = vadd.s32 1, %v3993_v61  ;;  %v4008_v23 = vand.u32 3, %v1415_v44 }
  0x62   : > { %v1292_v19 = vshrl.u32 %v1274_v50, %v1290_v3  ;;  %v1295_v20 = vadd.s32 127, %v1294_v12  ;;  %vm963_vm8 = vc.u32 %v3998_v2, %v3992_v60  ;;  %v1128_v63 = vand.u32 31, %v1126_v16 }
  0x63   : > { %v1405_v48 = vmul.f32 %v1404_v34, %v1402_v62  ;;  %v1307_v53 = vsel %vm3972_vm5, 0, %v1305_v46  ;;  %v965_v35 = vsel %vm963_vm8, %v964_v36, %v3993_v61  ;;  %v1127_v24 = vshrl.u32 %v1126_v16, 5 }
  0x64   : > { %v1293_v25 = vor.u32 %v1292_v19, %v1291_v4  ;;  %v1296_v28 = vshll.u32 %v1295_v20, 23  ;;  %v966_v29 = vadd.s32 %v965_v35, %v961_v14  ;;  %v1129_v31 = vsub.s32 32, %v1128_v63 }
  0x65   : > { %v1406_v21 = vxor.u32 2147483648, %v1405_v48  ;;  %v1131_v52 = vshll.u32 %v3648_v41, %v1128_v63  ;;  %v1134_v37 = vshll.u32 %v3649_v43, %v1128_v63  ;;  %v1137_v5 = vshll.u32 %v3650_v45, %v1128_v63 }
  0x66   : > { %v1297_v50 = vor.u32 4788187, %v1296_v28  ;;  %v1300_v51 = vcvt.s32.f32 %v1293_v25  ;;  %v967_v7 = vadd.s32 536870912, %v966_v29  ;;  %v1132_v11 = vshrl.u32 %v3649_v43, %v1129_v31 }
  0x67   : > { %v1407_v18 = vsel %vm1324_vm13, %v1406_v21, %v1405_v48  ;;  %v1135_v54 = vshrl.u32 %v3650_v45, %v1129_v31  ;;  %v1138_v42 = vshrl.u32 %v3651_v47, %v1129_v31  ;;  %v1140_v55 = vshll.u32 %v3651_v47, %v1128_v63 }
  0x68   : > { %v1410_v44 = vsel %vm3918_vm14, %v3793_v8, %v1407_v18  ;;  %v1298_v27 = vand.u32 2147483647, %v1297_v50  ;;  %v4025_v15 = vshrl.u32 %v967_v7, 30  ;;  %v4031_v13 = vshll.u32 %v1122_v26, 8 }
  0x69   : > { %3574 = vcosq.f32 %v1410_v44  ;;  %v1130_v57 = vshrl.u32 %v3648_v41, %v1129_v31  ;;  %v1141_v58 = vshrl.u32 %v3652_v49, %v1129_v31  ;;  %v1143_v59 = vshll.u32 %v3652_v49, %v1128_v63 }
  0x6a   : > { %3576 = vsinq.f32 %v1410_v44  ;;  %v1301_v34 = vmul.f32 %v1300_v51, %v1298_v27  ;;  %v969_v61 = vshll.u32 %v4025_v15, 30  ;;  %v1133_v62 = vor.u32 %v1132_v11, %v1131_v52 }
  0x6b   : > { %v1136_v0 = vor.u32 %v1135_v54, %v1134_v37  ;;  %v1144_v1 = vshrl.u32 %v3653_v56, %v1129_v31  ;;  %v1139_v4 = vor.u32 %v1138_v42, %v1137_v5  ;;  %v1142_v12 = vor.u32 %v1141_v58, %v1140_v55 }
  0x6c   : > { %v1302_v3 = vxor.u32 2147483648, %v1301_v34  ;;  %vm1146_vm9 = vcmp.lt.s32.totalorder %v1127_v24, 1  ;;  %vm2242_vm10 = vcmp.eq.s32.totalorder %v4005_v17, 0  ;;  %v4039_v38 = vsub.s32 %v966_v29, %v969_v61 }
  0x6d   : > { %v1145_v26 = vor.u32 %v1144_v1, %v1143_v59  ;;  %vm1147_vm11 = vcmp.lt.s32.totalorder %v1127_v24, 2  ;;  %vm1149_vm12 = vcmp.lt.s32.totalorder %v1127_v24, 4  ;;  %vm2241_vm13 = vcmp.lt.s32.totalorder %v4005_v17, 2 }
  0x6e   : > { %v1303_v48 = vsel %vm1220_vm4, %v1302_v3, %v1301_v34  ;;  %vm1148_vm14 = vcmp.lt.s32.totalorder %v1127_v24, 3  ;;  %v1150_v46 = vsel %vm1146_vm9, %v1130_v57, %v1133_v62  ;;  %v1151_v14 = vsel %vm1149_vm12, %v1139_v4, 2102212464 }
  0x6f   : > { %vm1414_vm15 = vweird.f32 %v3793_v8  ;;  %v1306_v16 = vsel %vm3972_vm5, %v3796_v9, %v1303_v48  ;;  %v972_v19 = vsub.s32 0, %v4039_v38  ;;  %v1152_v20 = vsel %vm1148_vm14, %v1136_v0, %v1151_v14 }
  0x70   : > { %v1154_v36 = vsel %vm1146_vm9, %v1133_v62, %v1136_v0  ;;  %3578 = vcosq.f32 %v1306_v16  ;;  %v1311_v21 = vadd.s32 3, %v1307_v53  ;;  %v1155_v63 = vsel %vm1149_vm12, %v1142_v12, 920167782 }
  0x71   : > { %v1158_v25 = vsel %vm1146_vm9, %v1136_v0, %v1139_v4  ;;  %3580 = vsinq.f32 %v1306_v16  ;;  %v3389_v28 = vmin.u32 %v972_v19, %v4039_v38  ;;  %v1156_v35 = vsel %vm1148_vm14, %v1139_v4, %v1155_v63 }
  0x72   : > { %v1159_v32 = vsel %vm1149_vm12, %v1145_v26, 1326507024  ;;  %vm2395_vm0 = vcmask 1043456   ;;  %v4058_v18 = vand.u32 3, %v1307_v53  ;;  %v1153_v29 = vsel %vm1147_vm11, %v1150_v46, %v1152_v20 }
  0x73   : > { %v1157_v31 = vsel %vm1147_vm11, %v1154_v36, %v1156_v35  ;;  %v1160_v44 = vsel %vm1148_vm14, %v1142_v12, %v1159_v32  ;;  %v974_v50 = vclz %v3389_v28  ;;  %vm1421_vm1 = vcmp.eq.s32.totalorder %v4008_v23, 2 }
  0x74   : > { %v1161_v51 = vsel %vm1147_vm11, %v1158_v25, %v1160_v44  ;;  %v4065_v52 = vmul.u32.u64.low %v4031_v13, %v1157_v31  ;;  %v4066_v7 = vmul.u32.u64.high %v4031_v13, %v1157_v31, %v4065_v52  ;;  %vm2245_vm2 = vcmp.eq.s32.totalorder %v4005_v17, 2 }
  0x75   : > { %v4072_v53 = vmul.u32.u64.low %v4031_v13, %v1161_v51  ;;  %v4073_v37 = vmul.u32.u64.high %v4031_v13, %v1161_v51, %v4072_v53  ;;  %vm1417_vm3 = vcmp.lt.s32.totalorder %v4008_v23, 2  ;;  %vm1418_vm4 = vcmp.eq.s32.totalorder %v4008_v23, 0 }
  0x76   : > { %v3575_v11 = vpop.eup %3574  ;;  %v3390_v54 = vadd.s32 4294967294, %v974_v50  ;;  %v1312_v42 = vand.u32 3, %v1311_v21  ;;  %v962_v55 = vadd.s32 %v3992_v60, %v3998_v2  ;;  %v1169_v34 = vmul.u32 %v4031_v13, %v1153_v29 }
  0x77   : > { %v3577_v27 = vpop.eup %3576  ;;  %v1422_v24 = vxor.u32 2147483648, %v3575_v11  ;;  %vm2138_vm5 = vcmp.lt.s32.totalorder %v4058_v18, 2  ;;  %v1172_v59 = vadd.s32 1, %v4066_v7  ;;  %vm1310_vm7 = vweird.f32 %v3796_v9 }
  0x78   : > { %v1419_v5 = vxor.u32 2147483648, %v3577_v27  ;;  %vm3391_vm6 = vcmp.lt.s32.totalorder %v3390_v54, 0  ;;  %v805_v1 = vand.u32 2139095040, %v3907_v33  ;;  %vm1171_vm8 = vc.u32 %v4073_v37, %v4065_v52 }
  0x79   : > { %v1423_v57 = vsel %vm1421_vm1, %v1422_v24, %v3577_v27  ;;  %v2247_v58 = vsel %vm2245_vm2, %v1422_v24, %v3577_v27  ;;  %v977_v0 = vsel %vm3391_vm6, 0, %v3390_v54  ;;  %v1173_v46 = vsel %vm1171_vm8, %v1172_v59, %v4066_v7 }
  0x7a   : > { %v1420_v61 = vsel %vm1418_vm4, %v3575_v11, %v1419_v5  ;;  %v2244_v62 = vsel %vm2242_vm10, %v3575_v11, %v1419_v5  ;;  %v978_v13 = vsub.s32 32, %v977_v0  ;;  %v979_v3 = vshll.u32 %v4039_v38, %v977_v0 }
  0x7b   : > { %v1424_v60 = vsel %vm1417_vm3, %v1420_v61, %v1423_v57  ;;  %v2248_v2 = vsel %vm2241_vm13, %v2244_v62, %v2247_v58  ;;  %v982_v26 = vsub.s32 4294967266, %v977_v0  ;;  %v802_v17 = vand.u32 2147483647, %v3907_v33 }
  0x7c   : > { %v4093_v4 = vsel %vm1414_vm15, nan, %v1424_v60  ;;  %v2249_v12 = vsel %vm1414_vm15, nan, %v2248_v2  ;;  %v980_v23 = vshrl.u32 %v962_v55, %v978_v13  ;;  %vm2139_vm9 = vcmp.eq.s32.totalorder %v4058_v18, 0 }
  0x7d   : > { %v2273_v48 = vpack.c.bf16 %v2249_v12, %v2249_v12  ;;  %vm908_vm10 = vcmp.lt.s32.totalorder %v3799_v10, 0  ;;  %v983_v38 = vadd.s32 127, %v982_v26  ;;  %v1174_v14 = vadd.s32 %v1173_v46, %v1169_v34  ;;  %v3579_v19 = vpop.eup %3578 }
  0x7e   : > { %v806_v16 = vshrl.u32 %v805_v1, 23  ;;  %vm1314_vm11 = vcmp.eq.s32.totalorder %v1312_v42, 0  ;;  %vm1317_vm12 = vcmp.eq.s32.totalorder %v1312_v42, 2  ;;  %vm2142_vm13 = vcmp.eq.s32.totalorder %v4058_v18, 2  ;;  %v3581_v20 = vpop.eup %3580 }
  0x7f   : > { %3446 = vmatprep.subr.msk.bf16.mxu0 %vm2395_vm0, %v2273_v48  ;;  %v981_v8 = vor.u32 %v980_v23, %v979_v3  ;;  %v1318_v36 = vxor.u32 2147483648, %v3579_v19  ;;  %v984_v21 = vshll.u32 %v983_v38, 23  ;;  %v1175_v63 = vadd.s32 536870912, %v1174_v14 }
  0x80   : > { %v3384_v25 = vadd.s32 4294967169, %v806_v16  ;;  %vm1313_vm14 = vcmp.lt.s32.totalorder %v1312_v42, 2  ;;  %v1315_v28 = vxor.u32 2147483648, %v3581_v20  ;;  %v809_v32 = vand.u32 8388607, %v802_v17 }
  0x81   : > { %v988_v35 = vcvt.s32.f32 %v981_v8  ;;  %v1319_v29 = vsel %vm1317_vm12, %v1318_v36, %v3581_v20  ;;  %v2144_v31 = vsel %vm2142_vm13, %v1318_v36, %v3581_v20  ;;  %v985_v44 = vor.u32 4788187, %v984_v21 }
  0x82   : > { %v4107_v50 = vshrl.u32 %v1175_v63, 30  ;;  %v1316_v51 = vsel %vm1314_vm11, %v3579_v19, %v1315_v28  ;;  %v2141_v7 = vsel %vm2139_vm9, %v3579_v19, %v1315_v28  ;;  %v992_v11 = vsub.s32 4, %v4025_v15 }
  0x83   : > { %v812_v53 = vadd.s32 1, %v3384_v25  ;;  %v1320_v27 = vsel %vm1313_vm14, %v1316_v51, %v1319_v29  ;;  %v2145_v24 = vsel %vm2138_vm5, %v2141_v7, %v2144_v31  ;;  %v986_v54 = vand.u32 2147483647, %v985_v44 }
  0x84   : > { %v1177_v5 = vshll.u32 %v4107_v50, 30  ;;  %v4118_v55 = vsel %vm1310_vm7, nan, %v1320_v27  ;;  %v2146_v42 = vsel %vm1310_vm7, nan, %v2145_v24  ;;  %v810_v34 = vor.u32 8388608, %v809_v32 }
  0x85   : > { %vm813_vm15 = vcmp.gt.s32.totalorder %v812_v53, 0  ;;  %v2272_v57 = vpack.c.bf16 %v2146_v42, %v2146_v42  ;;  %v989_v58 = vmul.f32 %v988_v35, %v986_v54  ;;  %vm4126_vm1 = vcmp.le.f32.partialorder %v906_v22, 0.7853982 }
  0x86   : > { %v4122_v59 = vsub.s32 %v1174_v14, %v1177_v5  ;;  %v814_v61 = vsel %vm813_vm15, %v812_v53, 0  ;;  %v4133_v62 = vsel %vm908_vm10, %v992_v11, %v4025_v15  ;;  %v1170_v9 = vadd.s32 %v4065_v52, %v4073_v37 }
  0x87   : > { %v816_v0 = vand.u32 31, %v814_v61  ;;  %v2397_v1 = vsel %vm2395_vm0, %v2272_v57, 0  ;;  %v990_v60 = vxor.u32 2147483648, %v989_v58  ;;  %v1013_v13 = vand.u32 2139095040, %v3914_v40 }
  0x88   : > { %v1180_v2 = vsub.s32 0, %v4122_v59  ;;  %2407 = vmatpush1.bf16.msra.mxu0 %v2397_v1  ;;  %v1200_v22 = vsub.s32 4, %v4107_v50  ;;  %v4141_v12 = vshll.u32 %v810_v34, 8  ;;  %v1010_v15 = vand.u32 2147483647, %v3914_v40 }
  0x89   : > { %v817_v3 = vsub.s32 32, %v816_v0  ;;  %v991_v26 = vsel %vm908_vm10, %v990_v60, %v989_v58  ;;  %v815_v37 = vshrl.u32 %v814_v61, 5  ;;  %v819_v48 = vshll.u32 %v3648_v41, %v816_v0 }
  0x8a   : > { %v3397_v52 = vmin.u32 %v1180_v2, %v4122_v59  ;;  %v994_v23 = vsel %vm4126_vm1, %v3799_v10, %v991_v26  ;;  %vm1116_vm0 = vcmp.lt.s32.totalorder %v3812_v30, 0  ;;  %v822_v46 = vshll.u32 %v3649_v43, %v816_v0 }
  0x8b   : > { %v825_v38 = vshll.u32 %v3650_v45, %v816_v0  ;;  %v828_v14 = vshll.u32 %v3651_v47, %v816_v0  ;;  %3582 = vcosq.f32 %v994_v23  ;;  %v820_v19 = vshrl.u32 %v3649_v43, %v817_v3 }
  0x8c   : > { %v1182_v16 = vclz %v3397_v52  ;;  %v1014_v8 = vshrl.u32 %v1013_v13, 23  ;;  %v818_v20 = vshrl.u32 %v3648_v41, %v817_v3  ;;  %v823_v36 = vshrl.u32 %v3650_v45, %v817_v3 }
  0x8d   : > { %v826_v21 = vshrl.u32 %v3651_v47, %v817_v3  ;;  %v829_v63 = vshrl.u32 %v3652_v49, %v817_v3  ;;  %v821_v28 = vor.u32 %v820_v19, %v819_v48  ;;  %v831_v35 = vshll.u32 %v3652_v49, %v816_v0 }
  0x8e   : > { %v3398_v25 = vadd.s32 4294967294, %v1182_v16  ;;  %v832_v32 = vshrl.u32 %v3653_v56, %v817_v3  ;;  %v824_v29 = vor.u32 %v823_v36, %v822_v46  ;;  %vm834_vm2 = vcmp.lt.s32.totalorder %v815_v37, 1 }
  0x8f   : > { %v827_v31 = vor.u32 %v826_v21, %v825_v38  ;;  %v830_v44 = vor.u32 %v829_v63, %v828_v14  ;;  %vm4164_vm3 = vcmp.le.f32.partialorder %v1114_v39, 0.7853982  ;;  %vm835_vm5 = vcmp.lt.s32.totalorder %v815_v37, 2 }
  0x90   : > { %vm3399_vm4 = vcmp.lt.s32.totalorder %v3398_v25, 0  ;;  %v833_v7 = vor.u32 %v832_v32, %v831_v35  ;;  %vm836_vm6 = vcmp.lt.s32.totalorder %v815_v37, 3  ;;  %vm837_vm7 = vcmp.lt.s32.totalorder %v815_v37, 4 }
  0x91   : > { %v1185_v11 = vsel %vm3399_vm4, 0, %v3398_v25  ;;  %v838_v53 = vsel %vm834_vm2, %v818_v20, %v821_v28  ;;  %v842_v27 = vsel %vm834_vm2, %v821_v28, %v824_v29  ;;  %v839_v42 = vsel %vm837_vm7, %v827_v31, 2102212464 }
  0x92   : > { %v1186_v24 = vsub.s32 32, %v1185_v11  ;;  %v1187_v54 = vshll.u32 %v4122_v59, %v1185_v11  ;;  %v1190_v5 = vsub.s32 4294967266, %v1185_v11  ;;  %v840_v39 = vsel %vm836_vm6, %v824_v29, %v839_v42 }
  0x93   : > { %v843_v34 = vsel %vm837_vm7, %v830_v44, 920167782  ;;  %v846_v57 = vsel %vm834_vm2, %v824_v29, %v827_v31  ;;  %v847_v58 = vsel %vm837_vm7, %v833_v7, 1326507024  ;;  %v1201_v1 = vsel %vm1116_vm0, %v1200_v22, %v4107_v50 }
  0x94   : > { %v1188_v61 = vshrl.u32 %v1170_v9, %v1186_v24  ;;  %v1191_v0 = vadd.s32 127, %v1190_v5  ;;  %v844_v60 = vsel %vm836_vm6, %v827_v31, %v843_v34  ;;  %3584 = vsinq.f32 %v994_v23 }
  0x95   : > { %v845_v2 = vsel %vm835_vm5, %v842_v27, %v844_v60  ;;  %v848_v59 = vsel %vm836_vm6, %v830_v44, %v847_v58  ;;  %v3392_v13 = vadd.s32 4294967169, %v1014_v8  ;;  %v841_v52 = vsel %vm835_vm5, %v838_v53, %v840_v39 }
  0x96   : > { %v1189_v3 = vor.u32 %v1188_v61, %v1187_v54  ;;  %v1192_v26 = vshll.u32 %v1191_v0, 23  ;;  %v849_v48 = vsel %vm835_vm5, %v846_v57, %v848_v59  ;;  %v4193_v23 = vsel %vm4126_vm1, 0, %v4133_v62 }
  0x97   : > { %v4182_v9 = vmul.u32.u64.low %v4141_v12, %v849_v48  ;;  %v4183_v46 = vmul.u32.u64.high %v4141_v12, %v849_v48, %v4182_v9  ;;  %v4186_v50 = vmul.u32.u64.low %v4141_v12, %v845_v2  ;;  %v4187_v22 = vmul.u32.u64.high %v4141_v12, %v845_v2, %v4186_v50 }
  0x98   : > { %v1193_v38 = vor.u32 4788187, %v1192_v26  ;;  %v1196_v14 = vcvt.s32.f32 %v1189_v3  ;;  %v1020_v16 = vadd.s32 1, %v3392_v13  ;;  %v4195_v19 = vpop.eup %3582  ;;  %v4199_v37 = vsel %vm4164_vm3, 0, %v1201_v1 }
  0x99   : > { %v701_v8 = vand.u32 2139095040, %v3787_v6  ;;  %v857_v36 = vmul.u32 %v4141_v12, %v841_v52  ;;  %v1017_v21 = vand.u32 8388607, %v1010_v15  ;;  %v4206_v18 = vand.u32 3, %v4193_v23 }
  0x9a   : > { %v1194_v20 = vand.u32 2147483647, %v1193_v38  ;;  %vm1021_vm8 = vcmp.gt.s32.totalorder %v1020_v16, 0  ;;  %vm859_vm9 = vc.u32 %v4183_v46, %v4186_v50  ;;  %v860_v62 = vadd.s32 1, %v4187_v22 }
  0x9b   : > { %v1022_v25 = vsel %vm1021_vm8, %v1020_v16, 0  ;;  %v4212_v28 = vand.u32 3, %v4199_v37  ;;  %v1018_v29 = vor.u32 8388608, %v1017_v21  ;;  %v702_v31 = vshrl.u32 %v701_v8, 23 }
  0x9c   : > { %v1197_v63 = vmul.f32 %v1196_v14, %v1194_v20  ;;  %v861_v6 = vsel %vm859_vm9, %v860_v62, %v4187_v22  ;;  %v1024_v12 = vand.u32 31, %v1022_v25  ;;  %v1006_v44 = vxor.u32 2147483648, %v4195_v19 }
  0x9d   : > { %v862_v32 = vadd.s32 %v861_v6, %v857_v36  ;;  %vm1833_vm10 = vcmp.eq.s32.totalorder %v4206_v18, 2  ;;  %vm1830_vm11 = vcmp.eq.s32.totalorder %v4206_v18, 0  ;;  %v1023_v39 = vshrl.u32 %v1022_v25, 5 }
  0x9e   : > { %v1198_v35 = vxor.u32 2147483648, %v1197_v63  ;;  %v1025_v7 = vsub.s32 32, %v1024_v12  ;;  %v1027_v11 = vshll.u32 %v3648_v41, %v1024_v12  ;;  %v1030_v53 = vshll.u32 %v3649_v43, %v1024_v12 }
  0x9f   : > { %v863_v24 = vadd.s32 536870912, %v862_v32  ;;  %v1033_v54 = vshll.u32 %v3650_v45, %v1024_v12  ;;  %v1036_v5 = vshll.u32 %v3651_v47, %v1024_v12  ;;  %v1039_v59 = vshll.u32 %v3652_v49, %v1024_v12 }
  0xa0   : > { %v1199_v27 = vsel %vm1116_vm0, %v1198_v35, %v1197_v63  ;;  %v1028_v34 = vshrl.u32 %v3649_v43, %v1025_v7  ;;  %v1031_v57 = vshrl.u32 %v3650_v45, %v1025_v7  ;;  %v1034_v0 = vshrl.u32 %v3651_v47, %v1025_v7 }
  0xa1   : > { %v1202_v42 = vsel %vm4164_vm3, %v3812_v30, %v1199_v27  ;;  %v4229_v58 = vpop.eup %3584  ;;  %v864_v61 = vshrl.u32 %v863_v24, 30  ;;  %v1037_v1 = vshrl.u32 %v3652_v49, %v1025_v7  ;;  %vm1829_vm12 = vcmp.lt.s32.totalorder %v4206_v18, 2 }
  0xa2   : > { %3586 = vcosq.f32 %v1202_v42  ;;  %v1029_v60 = vor.u32 %v1028_v34, %v1027_v11  ;;  %v1032_v2 = vor.u32 %v1031_v57, %v1030_v53  ;;  %vm804_vm13 = vcmp.lt.s32.totalorder %v3907_v33, 0 }
  0xa3   : > { %3588 = vsinq.f32 %v1202_v42  ;;  %v865_v51 = vshll.u32 %v864_v61, 30  ;;  %v1035_v13 = vor.u32 %v1034_v0, %v1033_v54  ;;  %v1038_v3 = vor.u32 %v1037_v1, %v1036_v5 }
  0xa4   : > { %v4236_v26 = vshll.u32 %v1018_v29, 8  ;;  %v1003_v52 = vxor.u32 2147483648, %v4229_v58  ;;  %v1026_v48 = vshrl.u32 %v3648_v41, %v1025_v7  ;;  %v1040_v9 = vshrl.u32 %v3653_v56, %v1025_v7 }
  0xa5   : > { %vm1042_vm14 = vcmp.lt.s32.totalorder %v1023_v39, 1  ;;  %v4241_v22 = vsub.s32 %v862_v32, %v865_v51  ;;  %vm1044_vm15 = vcmp.lt.s32.totalorder %v1023_v39, 3  ;;  %vm1045_vm1 = vcmp.lt.s32.totalorder %v1023_v39, 4 }
  0xa6   : > { %v3380_v38 = vadd.s32 4294967169, %v702_v31  ;;  %vm4245_vm0 = vcmp.le.f32.partialorder %v802_v17, 0.7853982  ;;  %v1041_v16 = vor.u32 %v1040_v9, %v1039_v59  ;;  %vm1043_vm2 = vcmp.lt.s32.totalorder %v1023_v39, 2  ;;  %v4286_v39 = vld [vmem:[%s3784_s19 + $0x8] sm:$0xff] }
  0xa7   : > { %v1047_v8 = vsel %vm1045_vm1, %v1035_v13, 2102212464  ;;  %v1050_v20 = vsel %vm1042_vm14, %v1029_v60, %v1032_v2  ;;  %vm998_vm3 = vweird.f32 %v3799_v10  ;;  %v868_v36 = vsub.s32 0, %v4241_v22 }
  0xa8   : > { %v888_v21 = vsub.s32 4, %v864_v61  ;;  %v1051_v62 = vsel %vm1045_vm1, %v1038_v3, 920167782  ;;  %v1054_v63 = vsel %vm1042_vm14, %v1032_v2, %v1035_v13  ;;  %v1046_v25 = vsel %vm1042_vm14, %v1026_v48, %v1029_v60 }
  0xa9   : > { %v1048_v6 = vsel %vm1044_vm15, %v1032_v2, %v1047_v8  ;;  %v1052_v12 = vsel %vm1044_vm15, %v1035_v13, %v1051_v62  ;;  %v1055_v17 = vsel %vm1045_vm1, %v1041_v16, 1326507024  ;;  %vm1206_vm4 = vweird.f32 %v3812_v30 }
  0xaa   : > { %v1835_v35 = vsel %vm1833_vm10, %v1006_v44, %v4229_v58  ;;  %v3385_v32 = vmin.u32 %v868_v36, %v4241_v22  ;;  %v1053_v29 = vsel %vm1043_vm2, %v1050_v20, %v1052_v12  ;;  %v1056_v31 = vsel %vm1044_vm15, %v1038_v3, %v1055_v17 }
  0xab   : > { %v1832_v7 = vsel %vm1830_vm11, %v4195_v19, %v1003_v52  ;;  %v1057_v11 = vsel %vm1043_vm2, %v1054_v63, %v1056_v31  ;;  %v4269_v53 = vmul.u32.u64.low %v4236_v26, %v1053_v29  ;;  %v4270_v27 = vmul.u32.u64.high %v4236_v26, %v1053_v29, %v4269_v53 }
  0xac   : > { %v870_v24 = vclz %v3385_v32  ;;  %v1049_v54 = vsel %vm1043_vm2, %v1046_v25, %v1048_v6  ;;  %v4275_v5 = vmul.u32.u64.low %v4236_v26, %v1057_v11  ;;  %v4276_v42 = vmul.u32.u64.high %v4236_v26, %v1057_v11, %v4275_v5 }
  0xad   : > { %vm2035_vm5 = vcmp.lt.s32.totalorder %v4212_v28, 2  ;;  %vm2036_vm6 = vcmp.eq.s32.totalorder %v4212_v28, 0  ;;  %v889_v34 = vsel %vm804_vm13, %v888_v21, %v864_v61  ;;  %v708_v57 = vadd.s32 1, %v3380_v38 }
  0xae   : > { %vm2039_vm7 = vcmp.eq.s32.totalorder %v4212_v28, 2  ;;  %v858_v0 = vadd.s32 %v4186_v50, %v4183_v46  ;;  %v3386_v1 = vadd.s32 4294967294, %v870_v24  ;;  %v698_v60 = vand.u32 2147483647, %v4286_v39  ;;  %v4331_v24 = vld [vmem:[%s3784_s19] sm:$0xff] }
  0xaf   : > { %v4289_v2 = vpop.eup %3586  ;;  %v1836_v59 = vsel %vm1829_vm12, %v1832_v7, %v1835_v35  ;;  %v1065_v51 = vmul.u32 %v4236_v26, %v1049_v54  ;;  %v1068_v61 = vadd.s32 1, %v4270_v27  ;;  %vm709_vm8 = vcmp.gt.s32.totalorder %v708_v57, 0 }
  0xb0   : > { %v4295_v13 = vpop.eup %3588  ;;  %v1214_v3 = vxor.u32 2147483648, %v4289_v2  ;;  %vm3387_vm9 = vcmp.lt.s32.totalorder %v3386_v1, 0  ;;  %v4300_v46 = vsel %vm4245_vm0, 0, %v889_v34  ;;  %vm1067_vm10 = vc.u32 %v4276_v42, %v4269_v53 }
  0xb1   : > { %v1211_v50 = vxor.u32 2147483648, %v4295_v13  ;;  %v873_v18 = vsel %vm3387_vm9, 0, %v3386_v1  ;;  %v1069_v26 = vsel %vm1067_vm10, %v1068_v61, %v4270_v27  ;;  %v710_v48 = vsel %vm709_vm8, %v708_v57, 0 }
  0xb2   : > { %v2041_v9 = vsel %vm2039_vm7, %v1214_v3, %v4295_v13  ;;  %v874_v38 = vsub.s32 32, %v873_v18  ;;  %v875_v16 = vshll.u32 %v4241_v22, %v873_v18  ;;  %v878_v8 = vsub.s32 4294967266, %v873_v18 }
  0xb3   : > { %v1837_v20 = vsel %vm998_vm3, nan, %v1836_v59  ;;  %v2038_v36 = vsel %vm2036_vm6, %v4289_v2, %v1211_v50  ;;  %v1070_v21 = vadd.s32 %v1069_v26, %v1065_v51  ;;  %v712_v62 = vand.u32 31, %v710_v48 }
  0xb4   : > { %v2042_v63 = vsel %vm2035_vm5, %v2038_v36, %v2041_v9  ;;  %v876_v25 = vshrl.u32 %v858_v0, %v874_v38  ;;  %v879_v6 = vadd.s32 127, %v878_v8  ;;  %v4324_v17 = vand.u32 3, %v4300_v46 }
  0xb5   : > { %v2043_v22 = vsel %vm1206_vm4, nan, %v2042_v63  ;;  %v1071_v12 = vadd.s32 536870912, %v1070_v21  ;;  %v713_v35 = vsub.s32 32, %v712_v62  ;;  %v705_v7 = vand.u32 8388607, %v698_v60 }
  0xb6   : > { %v2271_v32 = vpack.c.bf16 %v2043_v22, %v1837_v20  ;;  %v877_v29 = vor.u32 %v876_v25, %v875_v16  ;;  %v880_v31 = vshll.u32 %v879_v6, 23  ;;  %v715_v28 = vshll.u32 %v3648_v41, %v712_v62 }
  0xb7   : > { %v1072_v11 = vshrl.u32 %v1071_v12, 30  ;;  %v718_v27 = vshll.u32 %v3649_v43, %v712_v62  ;;  %v594_v54 = vand.u32 2147483647, %v4331_v24  ;;  %v716_v57 = vshrl.u32 %v3649_v43, %v713_v35 }
  0xb8   : > { %2408 = vmatprep.subr.bf16.mxu0 %v2271_v32  ;;  %v881_v5 = vor.u32 4788187, %v880_v31  ;;  %v884_v34 = vcvt.s32.f32 %v877_v29  ;;  %v719_v0 = vshrl.u32 %v3650_v45, %v713_v35  ;;  %v711_v59 = vshrl.u32 %v710_v48, 5 }
  0xb9   : > { %v1073_v1 = vshll.u32 %v1072_v11, 30  ;;  %v721_v51 = vshll.u32 %v3650_v45, %v712_v62  ;;  %v722_v61 = vshrl.u32 %v3651_v47, %v713_v35  ;;  %v706_v26 = vor.u32 8388608, %v705_v7 }
  0xba   : > { %v882_v18 = vand.u32 2147483647, %v881_v5  ;;  %v724_v9 = vshll.u32 %v3651_v47, %v712_v62  ;;  %v725_v38 = vshrl.u32 %v3652_v49, %v713_v35  ;;  %vm1012_vm11 = vcmp.lt.s32.totalorder %v3914_v40, 0 }
  0xbb   : > { %v4341_v16 = vsub.s32 %v1070_v21, %v1073_v1  ;;  %v727_v8 = vshll.u32 %v3652_v49, %v712_v62  ;;  %v728_v20 = vshrl.u32 %v3653_v56, %v713_v35  ;;  %v597_v48 = vand.u32 2139095040, %v4331_v24 }
  0xbc   : > { %v885_v36 = vmul.f32 %v884_v34, %v882_v18  ;;  %v717_v63 = vor.u32 %v716_v57, %v715_v28  ;;  %v720_v25 = vor.u32 %v719_v0, %v718_v27  ;;  %v726_v6 = vor.u32 %v725_v38, %v724_v9 }
  0xbd   : > { %v1076_v22 = vsub.s32 0, %v4341_v16  ;;  %v714_v12 = vshrl.u32 %v3648_v41, %v713_v35  ;;  %v723_v32 = vor.u32 %v722_v61, %v721_v51  ;;  %vm730_vm12 = vcmp.lt.s32.totalorder %v711_v59, 1 }
  0xbe   : > { %v886_v29 = vxor.u32 2147483648, %v885_v36  ;;  %vm732_vm14 = vcmp.lt.s32.totalorder %v711_v59, 3  ;;  %vm733_vm15 = vcmp.lt.s32.totalorder %v711_v59, 4  ;;  %v746_v21 = vshll.u32 %v706_v26, 8 }
  0xbf   : > { %v3393_v62 = vmin.u32 %v1076_v22, %v4341_v16  ;;  %v1096_v31 = vsub.s32 4, %v1072_v11  ;;  %v729_v7 = vor.u32 %v728_v20, %v727_v8  ;;  %vm731_vm1 = vcmp.lt.s32.totalorder %v711_v59, 2 }
  0xc0   : > { %v887_v28 = vsel %vm804_vm13, %v886_v29, %v885_v36  ;;  %v735_v27 = vsel %vm733_vm15, %v723_v32, 2102212464  ;;  %v738_v5 = vsel %vm730_vm12, %v717_v63, %v720_v25  ;;  %v739_v35 = vsel %vm733_vm15, %v726_v6, 920167782 }
  0xc1   : > { %v890_v34 = vsel %vm4245_vm0, %v3907_v33, %v887_v28  ;;  %v1078_v57 = vclz %v3393_v62  ;;  %v734_v0 = vsel %vm730_vm12, %v714_v12, %v717_v63  ;;  %v740_v1 = vsel %vm732_vm14, %v723_v32, %v739_v35 }
  0xc2   : > { %3590 = vcosq.f32 %v890_v34  ;;  %v736_v51 = vsel %vm732_vm14, %v720_v25, %v735_v27  ;;  %v741_v61 = vsel %vm731_vm1, %v738_v5, %v740_v1  ;;  %v742_v18 = vsel %vm730_vm12, %v720_v25, %v723_v32 }
  0xc3   : > { %3592 = vsinq.f32 %v890_v34  ;;  %v1066_v26 = vadd.s32 %v4269_v53, %v4276_v42  ;;  %v3394_v9 = vadd.s32 4294967294, %v1078_v57  ;;  %v743_v14 = vsel %vm733_vm15, %v729_v7, 1326507024 }
  0xc4   : > { %v1097_v38 = vsel %vm1012_vm11, %v1096_v31, %v1072_v11  ;;  %v744_v8 = vsel %vm732_vm14, %v726_v6, %v743_v14  ;;  %v4368_v20 = vmul.u32.u64.low %v746_v21, %v741_v61  ;;  %v4369_v36 = vmul.u32.u64.high %v746_v21, %v741_v61, %v4368_v20 }
  0xc5   : > { %vm3395_vm13 = vcmp.lt.s32.totalorder %v3394_v9, 0  ;;  %v737_v63 = vsel %vm731_vm1, %v734_v0, %v736_v51  ;;  %v745_v25 = vsel %vm731_vm1, %v742_v18, %v744_v8  ;;  %v598_v22 = vshrl.u32 %v597_v48, 23 }
  0xc6   : > { %v1081_v12 = vsel %vm3395_vm13, 0, %v3394_v9  ;;  %v4373_v32 = vmul.u32.u64.low %v746_v21, %v745_v25  ;;  %v4374_v53 = vmul.u32.u64.high %v746_v21, %v745_v25, %v4373_v32  ;;  %v999_v42 = vadd.s32 3, %v4193_v23 }
  0xc7   : > { %v1082_v29 = vsub.s32 32, %v1081_v12  ;;  %v1083_v11 = vshll.u32 %v4341_v16, %v1081_v12  ;;  %v1086_v62 = vsub.s32 4294967266, %v1081_v12  ;;  %v3376_v6 = vadd.s32 4294967169, %v598_v22 }
  0xc8   : > { %v753_v31 = vmul.u32 %v746_v21, %v737_v63  ;;  %v756_v7 = vadd.s32 1, %v4369_v36  ;;  %v4379_v28 = vand.u32 3, %v999_v42  ;;  %vm4383_vm0 = vcmp.le.f32.partialorder %v1010_v15, 0.7853982 }
  0xc9   : > { %v1084_v48 = vshrl.u32 %v1066_v26, %v1082_v29  ;;  %v1087_v27 = vadd.s32 127, %v1086_v62  ;;  %v604_v5 = vadd.s32 1, %v3376_v6  ;;  %v4389_v23 = vsel %vm4383_vm0, 0, %v1097_v38 }
  0xca   : > { %vm1727_vm2 = vcmp.eq.s32.totalorder %v4324_v17, 0  ;;  %vm755_vm5 = vc.u32 %v4374_v53, %v4368_v20  ;;  %v601_v16 = vand.u32 8388607, %v594_v54  ;;  %vm1002_vm7 = vcmp.eq.s32.totalorder %v4379_v28, 0 }
  0xcb   : > { %v1085_v21 = vor.u32 %v1084_v48, %v1083_v11  ;;  %v1088_v35 = vshll.u32 %v1087_v27, 23  ;;  %v757_v15 = vsel %vm755_vm5, %v756_v7, %v4369_v36  ;;  %vm605_vm6 = vcmp.gt.s32.totalorder %v604_v5, 0 }
  0xcc   : > { %v758_v34 = vadd.s32 %v757_v15, %v753_v31  ;;  %v606_v57 = vsel %vm605_vm6, %v604_v5, 0  ;;  %vm1005_vm8 = vcmp.eq.s32.totalorder %v4379_v28, 2  ;;  %vm1730_vm9 = vcmp.eq.s32.totalorder %v4324_v17, 2 }
  0xcd   : > { %v1089_v0 = vor.u32 4788187, %v1088_v35  ;;  %v1092_v1 = vcvt.s32.f32 %v1085_v21  ;;  %v608_v51 = vand.u32 31, %v606_v57  ;;  %vm1726_vm10 = vcmp.lt.s32.totalorder %v4324_v17, 2 }
  0xce   : > { %v759_v61 = vadd.s32 536870912, %v758_v34  ;;  %v602_v18 = vor.u32 8388608, %v601_v16  ;;  %v4403_v26 = vsel %vm1002_vm7, %v4195_v19, %v1003_v52  ;;  %v4408_v9 = vsel %vm1005_vm8, %v1006_v44, %v4229_v58 }
  0xcf   : > { %v4410_v14 = vpop.eup %3590  ;;  %v1090_v38 = vand.u32 2147483647, %v1089_v0  ;;  %v4413_v8 = vand.u32 3, %v4389_v23  ;;  %v609_v36 = vsub.s32 32, %v608_v51  ;;  %v1207_v63 = vadd.s32 3, %v4199_v37 }
  0xd0   : > { %v4416_v25 = vpop.eup %3592  ;;  %v4419_v22 = vadd.s32 %v4368_v20, %v4374_v53  ;;  %v4421_v52 = vshrl.u32 %v759_v61, 30  ;;  %v611_v19 = vshll.u32 %v3648_v41, %v608_v51  ;;  %v4425_v44 = vadd.s32 3, %v4300_v46 }
  0xd1   : > { %v899_v58 = vxor.u32 2147483648, %v4416_v25  ;;  %v902_v12 = vxor.u32 2147483648, %v4410_v14  ;;  %v1093_v32 = vmul.f32 %v1092_v1, %v1090_v38  ;;  %v612_v42 = vshrl.u32 %v3649_v43, %v609_v36 }
  0xd2   : > { %v761_v37 = vshll.u32 %v4421_v52, 30  ;;  %v614_v29 = vshll.u32 %v3649_v43, %v608_v51  ;;  %v615_v20 = vshrl.u32 %v3650_v45, %v609_v36  ;;  %v4433_v53 = vshll.u32 %v602_v18, 8 }
  0xd3   : > { %v1094_v11 = vxor.u32 2147483648, %v1093_v32  ;;  %v617_v62 = vshll.u32 %v3650_v45, %v608_v51  ;;  %v618_v46 = vshrl.u32 %v3651_v47, %v609_v36  ;;  %vm1001_vm12 = vcmp.lt.s32.totalorder %v4379_v28, 2 }
  0xd4   : > { %vm894_vm14 = vweird.f32 %v3907_v33  ;;  %v4439_v6 = vsub.s32 %v758_v34, %v761_v37  ;;  %v607_v31 = vshrl.u32 %v606_v57, 5  ;;  %v610_v7 = vshrl.u32 %v3648_v41, %v609_v36 }
  0xd5   : > { %v620_v43 = vshll.u32 %v3651_v47, %v608_v51  ;;  %v1095_v48 = vsel %vm1012_vm11, %v1094_v11, %v1093_v32  ;;  %v1729_v45 = vsel %vm1727_vm2, %v4410_v14, %v899_v58  ;;  %v1732_v27 = vsel %vm1730_vm9, %v902_v12, %v4416_v25 }
  0xd6   : > { %v613_v5 = vor.u32 %v612_v42, %v611_v19  ;;  %v1098_v41 = vsel %vm4383_vm0, %v3914_v40, %v1095_v48  ;;  %v764_v47 = vsub.s32 0, %v4439_v6  ;;  %v616_v16 = vor.u32 %v615_v20, %v614_v29 }
  0xd7   : > { %v621_v21 = vshrl.u32 %v3652_v49, %v609_v36  ;;  %3594 = vcosq.f32 %v1098_v41  ;;  %v619_v35 = vor.u32 %v618_v46, %v617_v62  ;;  %v623_v15 = vshll.u32 %v3652_v49, %v608_v51 }
  0xd8   : > { %v624_v34 = vshrl.u32 %v3653_v56, %v609_v36  ;;  %3596 = vsinq.f32 %v1098_v41  ;;  %v3381_v57 = vmin.u32 %v764_v47, %v4439_v6  ;;  %vm626_vm11 = vcmp.lt.s32.totalorder %v607_v31, 1 }
  0xd9   : > { %v1208_v0 = vand.u32 3, %v1207_v63  ;;  %v1733_v59 = vsel %vm1726_vm10, %v1729_v45, %v1732_v27  ;;  %v622_v1 = vor.u32 %v621_v21, %v620_v43  ;;  %vm627_vm15 = vcmp.lt.s32.totalorder %v607_v31, 2 }
  0xda   : > { %v625_v61 = vor.u32 %v624_v34, %v623_v15  ;;  %v766_v18 = vclz %v3381_v57  ;;  %vm628_vm1 = vcmp.lt.s32.totalorder %v607_v31, 3  ;;  %vm629_vm13 = vcmp.lt.s32.totalorder %v607_v31, 4 }
  0xdb   : > { %v630_v38 = vsel %vm626_vm11, %v610_v7, %v613_v5  ;;  %v631_v19 = vsel %vm629_vm13, %v619_v35, 2102212464  ;;  %v634_v32 = vsel %vm626_vm11, %v613_v5, %v616_v16  ;;  %v635_v49 = vsel %vm629_vm13, %v622_v1, 920167782 }
  0xdc   : > { %v638_v51 = vsel %vm626_vm11, %v616_v16, %v619_v35  ;;  %vm1936_vm0 = vcmp.eq.s32.totalorder %v4413_v8, 2  ;;  %v3382_v56 = vadd.s32 4294967294, %v766_v18  ;;  %v632_v36 = vsel %vm628_vm1, %v616_v16, %v631_v19 }
  0xdd   : > { %v636_v42 = vsel %vm628_vm1, %v619_v35, %v635_v49  ;;  %v639_v63 = vsel %vm629_vm13, %v625_v61, 1326507024  ;;  %vm1933_vm2 = vcmp.eq.s32.totalorder %v4413_v8, 0  ;;  %v633_v17 = vsel %vm627_vm15, %v630_v38, %v632_v36 }
  0xde   : > { %v637_v37 = vsel %vm627_vm15, %v634_v32, %v636_v42  ;;  %v640_v29 = vsel %vm628_vm1, %v622_v1, %v639_v63  ;;  %v1008_v20 = vsel %vm1001_vm12, %v4403_v26, %v4408_v9  ;;  %vm1932_vm5 = vcmp.lt.s32.totalorder %v4413_v8, 2 }
  0xdf   : > { %vm3383_vm6 = vcmp.lt.s32.totalorder %v3382_v56, 0  ;;  %v641_v11 = vsel %vm627_vm15, %v638_v51, %v640_v29  ;;  %v4476_v62 = vmul.u32.u64.low %v4433_v53, %v637_v37  ;;  %v4477_v46 = vmul.u32.u64.high %v4433_v53, %v637_v37, %v4476_v62 }
  0xe0   : > { %vm1102_vm7 = vweird.f32 %v3914_v40  ;;  %v1734_v7 = vsel %vm894_vm14, nan, %v1733_v59  ;;  %v769_v43 = vsel %vm3383_vm6, 0, %v3382_v56  ;;  %v649_v45 = vmul.u32 %v4433_v53, %v633_v17  ;;  %v2274_v40 = vld [vmem:[%s4855_s2] sm:$0xff] }
  0xe1   : > { %v4484_v48 = vmul.u32.u64.low %v4433_v53, %v641_v11  ;;  %v4485_v28 = vmul.u32.u64.high %v4433_v53, %v641_v11, %v4484_v48  ;;  %v770_v26 = vsub.s32 32, %v769_v43  ;;  %v771_v9 = vshll.u32 %v4439_v6, %v769_v43 }
  0xe2   : > { %v774_v31 = vsub.s32 4294967266, %v769_v43  ;;  %vm1209_vm8 = vcmp.lt.s32.totalorder %v1208_v0, 2  ;;  %vm1210_vm9 = vcmp.eq.s32.totalorder %v1208_v0, 0  ;;  %vm1213_vm10 = vcmp.eq.s32.totalorder %v1208_v0, 2  ;;  %v2276_v43 = vld [vmem:[%s4855_s2 + $0x10] sm:$0xff] }
  0xe3   : > { %v896_v27 = vand.u32 3, %v4425_v44  ;;  %v772_v5 = vshrl.u32 %v4419_v22, %v770_v26  ;;  %v652_v47 = vadd.s32 1, %v4477_v46  ;;  %v1212_v16 = vsel %vm1210_vm9, %v4289_v2, %v1211_v50 }
  0xe4   : > { %v775_v41 = vadd.s32 127, %v774_v31  ;;  %vm651_vm12 = vc.u32 %v4485_v28, %v4476_v62  ;;  %v4499_v53 = vsel %vm998_vm3, nan, %v1008_v20  ;;  %v1215_v44 = vsel %vm1213_vm10, %v1214_v3, %v4295_v13  ;;  %v3595_v22 = vpop.eup %3594 }
  0xe5   : > { %vm897_vm11 = vcmp.lt.s32.totalorder %v896_v27, 2  ;;  %v773_v6 = vor.u32 %v772_v5, %v771_v9  ;;  %v653_v35 = vsel %vm651_vm12, %v652_v47, %v4477_v46  ;;  %v1216_v15 = vsel %vm1209_vm8, %v1212_v16, %v1215_v44  ;;  %v3597_v50 = vpop.eup %3596  ;;  %v2275_v5 = vld [vmem:[%s4855_s2 + $0x8] sm:$0xff] }
  0xe6   : > { %v776_v21 = vshll.u32 %v775_v41, 23  ;;  %v1110_v34 = vxor.u32 2147483648, %v3595_v22  ;;  %v654_v57 = vadd.s32 %v653_v35, %v649_v45  ;;  %v4508_v10 = vsel %vm1206_vm4, nan, %v1216_v15 }
  0xe7   : > { %vm898_vm3 = vcmp.eq.s32.totalorder %v896_v27, 0  ;;  %v1107_v59 = vxor.u32 2147483648, %v3597_v50  ;;  %v780_v2 = vcvt.s32.f32 %v773_v6  ;;  %v2267_v13 = vpack.c.bf16 %v4508_v10, %v4499_v53  ;;  %v2513_v6 = vld [vmem:[%s4857_s4 + $0x10] sm:$0xff]  ;;  %v2285_v53 = vld [vmem:[%s4855_s2 + $0x58] sm:$0xff] }
  0xe8   : > { %v777_v1 = vor.u32 4788187, %v776_v21  ;;  %v1938_v3 = vsel %vm1936_vm0, %v1110_v34, %v3597_v50  ;;  %v655_v61 = vadd.s32 536870912, %v654_v57  ;;  %v900_v0 = vsel %vm898_vm3, %v4410_v14, %v899_v58 }
  0xe9   : > { %vm901_vm15 = vcmp.eq.s32.totalorder %v896_v27, 2  ;;  %v1935_v30 = vsel %vm1933_vm2, %v3595_v22, %v1107_v59  ;;  %v1103_v19 = vadd.s32 3, %v4389_v23  ;;  %vm4532_vm4 = vcmp.le.f32.partialorder %v698_v60, 0.7853982 }
  0xea   : > { %v778_v18 = vand.u32 2147483647, %v777_v1  ;;  %v903_v38 = vsel %vm901_vm15, %v902_v12, %v4416_v25  ;;  %v1939_v32 = vsel %vm1932_vm5, %v1935_v30, %v1938_v3  ;;  %v4525_v49 = vshrl.u32 %v655_v61, 30  ;;  %v2512_v61 = vld [vmem:[%s4857_s4 + $0x8] sm:$0xff] }
  0xeb   : > { %v904_v51 = vsel %vm897_vm11, %v900_v0, %v903_v38  ;;  %v1940_v58 = vsel %vm1102_vm7, nan, %v1939_v32  ;;  %v1104_v36 = vand.u32 3, %v1103_v19  ;;  %vm700_vm1 = vcmp.lt.s32.totalorder %v4286_v39, 0  ;;  %v2280_v19 = vld [vmem:[%s4855_s2 + $0x30] sm:$0xff] }
  0xec   : > { %v781_v56 = vmul.f32 %v780_v2, %v778_v18  ;;  %v2270_v42 = vpack.c.bf16 %v1940_v58, %v1734_v7  ;;  %v657_v23 = vshll.u32 %v4525_v49, 30  ;;  %v4540_v12 = vsel %vm894_vm14, nan, %v904_v51  ;;  %v2281_v58 = vld [vmem:[%s4855_s2 + $0x38] sm:$0xff] }
  0xed   : > { %vm1105_vm13 = vcmp.lt.s32.totalorder %v1104_v36, 2  ;;  %vm1106_vm0 = vcmp.eq.s32.totalorder %v1104_v36, 0  ;;  %vm1109_vm2 = vcmp.eq.s32.totalorder %v1104_v36, 2  ;;  %v784_v29 = vsub.s32 4, %v4421_v52 }
  0xee   : > { %v782_v8 = vxor.u32 2147483648, %v781_v56  ;;  %2409 = vmatpush1.bf16.msra.mxu0 %v2270_v42  ;;  %v658_v25 = vsub.s32 %v654_v57, %v657_v23  ;;  %v1108_v63 = vsel %vm1106_vm0, %v3595_v22, %v1107_v59  ;;  %v1111_v17 = vsel %vm1109_vm2, %v1110_v34, %v3597_v50  ;;  %v2511_v59 = vld [vmem:[%s4857_s4] sm:$0xff] }
  0xef   : > { %v1112_v37 = vsel %vm1105_vm13, %v1108_v63, %v1111_v17  ;;  %v785_v48 = vsel %vm700_vm1, %v784_v29, %v4421_v52  ;;  %v3654_v9 = vmov 0   ;;  %v2277_v52 = vld [vmem:[%s4855_s2 + $0x18] sm:$0xff]  ;;  %v650_v27 = vadd.s32 %v4476_v62, %v4485_v28  ;;  %v2278_v23 = vld [vmem:[%s4855_s2 + $0x20] sm:$0xff]  ;;  %v2716_v63 = vld [vmem:[%s4860_s7 + $0x10] sm:$0xff] }
  0xf0   : > { %v783_v60 = vsel %vm700_vm1, %v782_v8, %v781_v56  ;;  %v660_v11 = vsub.s32 0, %v658_v25  ;;  %v4550_v46 = vsel %vm1102_vm7, nan, %v1112_v37  ;;  %2434 = vmatprep.mubr.bf16.mxu0 %v3654_v9  ;;  %3553 = vset.pattern.permute.xlu0 %v3654_v9  ;;  %v787_v45 = vsel %vm4532_vm4, 0, %v785_v48  ;;  %v2514_v62 = vld [vmem:[%s4857_s4 + $0x18] sm:$0xff]  ;;  %v2826_v48 = vld [vmem:[%s4862_s9 + $0x10] sm:$0xff] }
  0xf1   : > { %v786_v20 = vsel %vm4532_vm4, %v4286_v39, %v783_v60  ;;  %v2266_v33 = vpack.c.bf16 %v4550_v46, %v4540_v12  ;;  %2298 = vperm.xlu0 %3553, %v2276_v43   ;;  %3554 = vset.pattern.permute.xlu1 %v3654_v9  ;;  %v1622_v47 = vand.u32 3, %v787_v45  ;;  %vm790_vm8 = vweird.f32 %v4286_v39  ;;  %v2717_v17 = vld [vmem:[%s4860_s7 + $0x18] sm:$0xff]  ;;  %v3143_v12 = vld [vmem:[%s4867_s14 + $0x8] sm:$0xff]  ;;  %v2828_v46 = vld [vmem:[%s4862_s9 + $0x20] sm:$0x1] }
  0xf2   : > { %3598 = vcosq.f32 %v786_v20  ;;  %v3377_v7 = vmin.u32 %v660_v11, %v658_v25  ;;  %2288 = vperm.xlu1 %3554, %v2274_v40   ;;  %2584 = vmatprep.mubr.bf16.mxu1 %v3654_v9  ;;  %vm596_vm9 = vcmp.lt.s32.totalorder %v4331_v24, 0  ;;  %vm4612_vm10 = vcmp.le.f32.partialorder %v594_v54, 0.7853982 }
  0xf3   : > { %3600 = vsinq.f32 %v786_v20  ;;  %vm1627_vm5 = vcmp.eq.s32.totalorder %v1622_v47, 2  ;;  %vm1624_vm6 = vcmp.eq.s32.totalorder %v1622_v47, 0  ;;  %vm1623_vm7 = vcmp.lt.s32.totalorder %v1622_v47, 2  ;;  %v2715_v20 = vld [vmem:[%s4860_s7 + $0x8] sm:$0xff] }
  0xf4   : > { %v662_v26 = vclz %v3377_v7  ;;  %v680_v14 = vsub.s32 4, %v4525_v49  ;;  %v791_v60 = vadd.s32 3, %v787_v45  ;;  %vm686_vm2 = vweird.f32 %v4331_v24 }
  0xf5   : > { %2303 = vperm.xlu0 %3553, %v2277_v52  }
  0xf6   : > { %v3378_v31 = vadd.s32 4294967294, %v662_v26  ;;  %2293 = vperm.xlu1 %3554, %v2275_v5   ;;  %v792_v11 = vand.u32 3, %v791_v60  ;;  %v2827_v26 = vld [vmem:[%s4862_s9 + $0x18] sm:$0xff] }
  0xf8   : > { %vm3379_vm14 = vcmp.lt.s32.totalorder %v3378_v31, 0  ;;  %vm794_vm12 = vcmp.eq.s32.totalorder %v792_v11, 0  ;;  %vm797_vm11 = vcmp.eq.s32.totalorder %v792_v11, 2  ;;  %vm793_vm4 = vcmp.lt.s32.totalorder %v792_v11, 2 }
  0xf9   : > { %v665_v41 = vsel %vm3379_vm14, 0, %v3378_v31  ;;  %2527 = vperm.xlu0 %3553, %v2513_v6   ;;  %v2824_v31 = vld [vmem:[%s4862_s9] sm:$0xff] }
  0xfa   : > { %v666_v16 = vsub.s32 32, %v665_v41  ;;  %v667_v44 = vshll.u32 %v658_v25, %v665_v41  ;;  %v670_v22 = vsub.s32 4294967266, %v665_v41  ;;  %2532 = vperm.xlu1 %3554, %v2514_v62   ;;  %v681_v25 = vsel %vm596_vm9, %v680_v14, %v4525_v49  ;;  %v2714_v49 = vld [vmem:[%s4860_s7] sm:$0xff]  ;;  %v2825_v41 = vld [vmem:[%s4862_s9 + $0x8] sm:$0xff] }
  0xfb   : > { %v683_v37 = vsel %vm4612_vm10, 0, %v681_v25 }
  0xfc   : > { %v668_v21 = vshrl.u32 %v650_v27, %v666_v16  ;;  %v671_v35 = vadd.s32 127, %v670_v22  ;;  %v687_v29 = vadd.s32 3, %v683_v37  ;;  %v1519_v7 = vand.u32 3, %v683_v37 }
  0xfd   : > { %2517 = vperm.xlu0 %3553, %v2511_v59  }
  0xfe   : > { %v669_v15 = vor.u32 %v668_v21, %v667_v44  ;;  %v672_v50 = vshll.u32 %v671_v35, 23  ;;  %2522 = vperm.xlu1 %3554, %v2512_v61   ;;  %v688_v43 = vand.u32 3, %v687_v29  ;;  %vm1521_vm3 = vcmp.eq.s32.totalorder %v1519_v7, 0  ;;  %v2282_v35 = vld [vmem:[%s4855_s2 + $0x40] sm:$0xff] }
  0xff   : > { %v4583_v28 = vpop.eup %3598  ;;  %vm1524_vm15 = vcmp.eq.s32.totalorder %v1519_v7, 2  ;;  %vm1520_vm0 = vcmp.lt.s32.totalorder %v1519_v7, 2 }
 0x100   : > { %v4585_v34 = vpop.eup %3600  ;;  %v798_v57 = vxor.u32 2147483648, %v4583_v28  ;;  %v673_v2 = vor.u32 4788187, %v672_v50  ;;  %v676_v3 = vcvt.s32.f32 %v669_v15  ;;  %vm690_vm1 = vcmp.eq.s32.totalorder %v688_v43, 0 }
 0x101   : > { %v795_v1 = vxor.u32 2147483648, %v4585_v34  ;;  %2318 = vperm.xlu0 %3553, %v2280_v19   ;;  %vm693_vm13 = vcmp.eq.s32.totalorder %v688_v43, 2  ;;  %vm689_vm14 = vcmp.lt.s32.totalorder %v688_v43, 2 }
 0x102   : > { %v1629_v0 = vsel %vm1627_vm5, %v798_v57, %v4585_v34  ;;  %v674_v18 = vand.u32 2147483647, %v673_v2  ;;  %2323 = vperm.xlu1 %3554, %v2281_v58   ;;  %v799_v5 = vsel %vm797_vm11, %v798_v57, %v4585_v34  ;;  %v587_v34 = vld [vmem:[%s3784_s19 + $0x28] sm:$0xff]  ;;  %vm2376_vm5 = vcmask 719872   ;;  %v3559_v58 = vld [vmem:[%s4891_s22 + $0x20] sm:$0xff]  }
 0x103   : > { %v1626_v30 = vsel %vm1624_vm6, %v4583_v28, %v795_v1  ;;  %v796_v27 = vsel %vm794_vm12, %v4583_v28, %v795_v1  ;;  %v2283_v28 = vld [vmem:[%s4855_s2 + $0x48] sm:$0xff]  ;;  %v3070_v1 = vld [vmem:[%s4865_s12] sm:$0xff]  ;;  %vm2545_vm6 = vcmask 261120   ;;  %vm3087_vm11 = vcmask 130048  }
 0x104   : > { %v1630_v38 = vsel %vm1623_vm7, %v1626_v30, %v1629_v0  ;;  %v677_v51 = vmul.f32 %v676_v3, %v674_v18  ;;  %v800_v22 = vsel %vm793_vm4, %v796_v27, %v799_v5  ;;  %v3071_v2 = vld [vmem:[%s4865_s12 + $0x8] sm:$0xff]  ;;  %v586_v3 = vld [vmem:[%s3784_s19 + $0x20] sm:$0xff] }
 0x105   : > { %v1631_v32 = vsel %vm790_vm8, nan, %v1630_v38  ;;  %2308 = vperm.xlu0 %3553, %v2278_v23   ;;  %v801_v57 = vsel %vm790_vm8, nan, %v800_v22  ;;  %v585_v0 = vld [vmem:[%s3784_s19 + $0x18] sm:$0xff]  ;;  %v2284_v30 = vld [vmem:[%s4855_s2 + $0x50] sm:$0xff]  ;;  %v3142_v38 = vld [vmem:[%s4867_s14] sm:$0xff] }
 0x106   : > { %v2269_v56 = vpack.c.bf16 %v1631_v32, %v4093_v4  ;;  %v678_v42 = vxor.u32 2147483648, %v677_v51  ;;  %v2279_v4 = vld [vmem:[%s4855_s2 + $0x28] sm:$0xff]  ;;  %v2263_v10 = vpack.c.bf16 %v585_v0, %v4286_v39  ;;  %v3555_v39 = vld [vmem:[%s4891_s22] sm:$0xff]   ;;  %v3557_v32 = vld [vmem:[%s4891_s22 + $0x10] sm:$0xff]  }
 0x107   : > { %2313 = vperm.xlu1 %3554, %v2279_v4  }
 0x108   : > { %2410 = vmatprep.subr.bf16.mxu0 %v2269_v56  ;;  %v679_v8 = vsel %vm596_vm9, %v678_v42, %v677_v51  ;;  %v3558_v51 = vld [vmem:[%s4891_s22 + $0x18] sm:$0xff]   ;;  %v3560_v56 = vld [vmem:[%s4891_s22 + $0x28] sm:$0xff]  }
 0x109   : > { %v682_v54 = vsel %vm4612_vm10, %v4331_v24, %v679_v8  ;;  %2730 = vperm.xlu0 %3553, %v2716_v63  }
 0x10a   : > { %3602 = vcosq.f32 %v682_v54 }
 0x10b   : > { %3604 = vsinq.f32 %v682_v54  ;;  %2735 = vperm.xlu1 %3554, %v2717_v17  }
 0x10d   : > { %2720 = vperm.xlu0 %3553, %v2714_v49  }
 0x10f   : > { %2725 = vperm.xlu1 %3554, %v2715_v20  }
 0x111   : > { %2841 = vperm.xlu0 %3553, %v2826_v48  }
 0x113   : > { %2846 = vperm.xlu1 %3554, %v2827_v26  }
 0x115   : > { %2831 = vperm.xlu0 %3553, %v2824_v31  }
 0x117   : > { %v3603_v40 = vpop.eup %3602  ;;  %2836 = vperm.xlu1 %3554, %v2825_v41  }
 0x118   : > { %v3605_v45 = vpop.eup %3604  ;;  %v694_v52 = vxor.u32 2147483648, %v3603_v40 }
 0x119   : > { %v691_v47 = vxor.u32 2147483648, %v3605_v45  ;;  %2328 = vperm.xlu0 %3553, %v2282_v35   ;;  %v3562_v35 = vld [vmem:[%s4856_s3 + $0x8] sm:$0xff]  }
 0x11a   : > { %v1526_v16 = vsel %vm1524_vm15, %v694_v52, %v3605_v45  ;;  %v695_v21 = vsel %vm693_vm13, %v694_v52, %v3605_v45 }
 0x11b   : > { %v1523_v44 = vsel %vm1521_vm3, %v3603_v40, %v691_v47  ;;  %v692_v6 = vsel %vm690_vm1, %v3603_v40, %v691_v47  ;;  %2333 = vperm.xlu1 %3554, %v2283_v28  }
 0x11c   : > { %v1527_v62 = vsel %vm1520_vm0, %v1523_v44, %v1526_v16  ;;  %v696_v59 = vsel %vm689_vm14, %v692_v6, %v695_v21  ;;  %v3561_v21 = vld [vmem:[%s4856_s3] sm:$0xff]  }
 0x11d   : > { %v1528_v15 = vsel %vm686_vm2, nan, %v1527_v62  ;;  %v697_v61 = vsel %vm686_vm2, nan, %v696_v59  ;;  %3074 = vperm.xlu0 %3553, %v3070_v1  }
 0x11e   : > { %v2268_v50 = vpack.c.bf16 %v1528_v15, %v4118_v55  ;;  %v2265_v55 = vpack.c.bf16 %v801_v57, %v587_v34  ;;  %v2264_v18 = vpack.c.bf16 %v697_v61, %v586_v3 }
 0x11f   : > { %3079 = vperm.xlu1 %3554, %v3071_v2  }
 0x120   : > { %2411 = vmatpush1.bf16.msra.mxu0 %v2268_v50 }
 0x121   : > { %2412 = vmatprep.subr.bf16.mxu0 %v2267_v13  ;;  %v584_v13 = vld [vmem:[%s3784_s19 + $0x10] sm:$0xff]  ;;  %2338 = vperm.xlu0 %3553, %v2284_v30   ;;  %s4790_s19 = scalar_lea.vmem %s4870_s17, %s3375_s1 }
 0x122   : > { %v2262_v19 = vpack.c.bf16 %v584_v13, %v4331_v24  ;;  %v3214_v24 = vld [vmem:[%s4869_s16] sm:$0xf] }
 0x123   : > { %2343 = vperm.xlu1 %3554, %v2285_v53  }
 0x124   : > { %2413 = vmatpush1.bf16.msra.mxu0 %v2266_v33  ;;  %v3556_v33 = vld [vmem:[%s4891_s22 + $0x8] sm:$0xff]  }
 0x125   : > { %2414 = vmatprep.subr.bf16.mxu0 %v2265_v55  ;;  %3146 = vperm.xlu0 %3553, %v3142_v38  }
 0x127   : > { %3151 = vperm.xlu1 %3554, %v3143_v12  }
 0x128   : > { %2415 = vmatpush1.bf16.msra.mxu0 %v2264_v18 }
 0x129   : > { %2416 = vmatprep.subr.bf16.mxu0 %v2263_v10  ;;  %2851 = vperm.xlu0 %3553, %v2828_v46  }
 0x12b   : > { %3217 = vperm.xlu1 %3554, %v3214_v24  }
 0x12c   : > { %2417 = vmatpush1.bf16.msra.mxu0 %v2262_v19 }
 0x12f   : > { %3447 = vmatmul.mubr.msk.bf16.vlgmr.msra.gmra.mxu0 %vm2376_vm5, %v3555_v39 }
 0x130   : > { %2444 = vmatprep.mubr.bf16.mxu0 %v3654_v9 }
 0x137   : > { %3448 = vmatmul.mubr.msk.bf16.gmra.mxu0 %vm2376_vm5, %v3556_v33 }
 0x138   : > { %2454 = vmatprep.mubr.bf16.mxu0 %v3654_v9 }
 0x13f   : > { %3449 = vmatmul.mubr.msk.bf16.gmra.mxu0 %vm2376_vm5, %v3557_v32 }
 0x140   : > { %2464 = vmatprep.mubr.bf16.mxu0 %v3654_v9 }
 0x147   : > { %3450 = vmatmul.mubr.msk.bf16.gmra.mxu0 %vm2376_vm5, %v3558_v51 }
 0x148   : > { %2474 = vmatprep.mubr.bf16.mxu0 %v3654_v9 }
 0x14f   : > { %3451 = vmatmul.mubr.msk.bf16.gmra.mxu0 %vm2376_vm5, %v3559_v58 }
 0x150   : > { %2484 = vmatprep.mubr.bf16.mxu0 %v3654_v9 }
 0x157   : > { %3452 = vmatmul.mubr.msk.bf16.gmra.mxu0 %vm2376_vm5, %v3560_v56 }
 0x158   : > { %3029 = vmatprep.mubr.bf16.mxu0 %v3654_v9 }
 0x16c   : > { %v2299_v23 = vpop.permute.xlu0 %2298 }
 0x16d   : > { %v2289_v8 = vpop.permute.xlu1 %2288 }
 0x170   : > { %v2304_v63 = vpop.permute.xlu0 %2303 }
 0x171   : > { %v2294_v17 = vpop.permute.xlu1 %2293 }
 0x174   : > { %v2528_v57 = vpop.permute.xlu0 %2527 }
 0x175   : > { %v2533_v50 = vpop.permute.xlu1 %2532 }
 0x178   : > { %v2518_v30 = vpop.permute.xlu0 %2517 }
 0x179   : > { %v2523_v2 = vpop.permute.xlu1 %2522 }
 0x1ef   : > { %v2436_v36 = vpop.f32.mrf.mxu0 }
 0x1f0   : > { %v2437_v52 = vadd.f32 %v2436_v36, %v2289_v8 }
 0x1f1   : > { %v2438_v42 = vpop.f32.mrf.mxu0 }
 0x1f2   : > { %v2439_v7 = vadd.f32 %v2438_v42, %v2289_v8  ;;  %v2495_v22 = vmax.f32 %v2437_v52, 0.0  ;;  %v3564_v8 = vld [vmem:[%s4858_s5 + $0x8] sm:$0xff]  }
 0x1f3   : > { %v2440_v14 = vpop.f32.mrf.mxu0 }
 0x1f4   : > { %v2441_v48 = vadd.f32 %v2440_v14, %v2294_v17  ;;  %v2496_v5 = vmax.f32 %v2439_v7, 0.0 }
 0x1f5   : > { %v2442_v4 = vpop.f32.mrf.mxu0 }
 0x1f6   : > { %v2443_v37 = vadd.f32 %v2442_v4, %v2294_v17  ;;  %v2497_v47 = vmax.f32 %v2441_v48, 0.0 }
 0x1f7   : > { %v2446_v54 = vpop.f32.mrf.mxu0 }
 0x1f8   : > { %v2447_v20 = vadd.f32 %v2446_v54, %v2299_v23  ;;  %v2498_v40 = vmax.f32 %v2443_v37, 0.0  ;;  %v2507_v6 = vpack.c.bf16 %v2497_v47, %v2495_v22 }
 0x1f9   : > { %v2448_v25 = vpop.f32.mrf.mxu0 }
 0x1fa   : > { %v2449_v29 = vadd.f32 %v2448_v25, %v2299_v23  ;;  %v2499_v27 = vmax.f32 %v2447_v20, 0.0  ;;  %v2508_v44 = vpack.c.bf16 %v2498_v40, %v2496_v5  ;;  %v3563_v23 = vld [vmem:[%s4858_s5] sm:$0xff]  }
 0x1fb   : > { %v2450_v60 = vpop.f32.mrf.mxu0 }
 0x1fc   : > { %v2451_v49 = vadd.f32 %v2450_v60, %v2304_v63  ;;  %v2500_v31 = vmax.f32 %v2449_v29, 0.0 }
 0x1fd   : > { %v2452_v11 = vpop.f32.mrf.mxu0 }
 0x1fe   : > { %v2453_v43 = vadd.f32 %v2452_v11, %v2304_v63  ;;  %v2501_v26 = vmax.f32 %v2451_v49, 0.0  ;;  %v2324_v49 = vpop.permute.xlu1 %2323  ;;  %v2319_v11 = vpop.permute.xlu0 %2318 }
 0x1ff   : > { %v2456_v4 = vpop.f32.mrf.mxu0 }
 0x200   : > { %v2502_v45 = vmax.f32 %v2453_v43, 0.0  ;;  %v2509_v16 = vpack.c.bf16 %v2501_v26, %v2499_v27 }
 0x201   : > { %v2458_v54 = vpop.f32.mrf.mxu0 }
 0x202   : > { %v2510_v41 = vpack.c.bf16 %v2502_v45, %v2500_v31  ;;  %v2314_v26 = vpop.permute.xlu1 %2313  ;;  %v2309_v45 = vpop.permute.xlu0 %2308 }
 0x203   : > { %v2460_v25 = vpop.f32.mrf.mxu0 }
 0x204   : > { %2564 = vmatprep.subr.bf16.mxu1 %v2510_v41  ;;  %v2459_v41 = vadd.f32 %v2458_v54, %v2309_v45 }
 0x205   : > { %2565 = vmatpush1.bf16.msra.mxu1 %v2509_v16  ;;  %v2462_v63 = vpop.f32.mrf.mxu0 }
 0x206   : > { %2566 = vmatprep.subr.bf16.mxu1 %v2508_v44  ;;  %v2463_v52 = vadd.f32 %v2462_v63, %v2314_v26 }
 0x207   : > { %v2466_v17 = vpop.f32.mrf.mxu0 }
 0x208   : > { %v2467_v47 = vadd.f32 %v2466_v17, %v2319_v11 }
 0x209   : > { %2567 = vmatpush1.bf16.msra.mxu1 %v2507_v6  ;;  %v2468_v37 = vpop.f32.mrf.mxu0 }
 0x20a   : > { %v2469_v27 = vadd.f32 %v2468_v37, %v2319_v11 }
 0x20b   : > { %v2470_v7 = vpop.f32.mrf.mxu0 }
 0x20c   : > { %3455 = vmatmul.mubr.msk.bf16.vlgmr.msra.gmra.mxu1 %vm2545_vm6, %v3561_v21  ;;  %v2471_v5 = vadd.f32 %v2470_v7, %v2324_v49 }
 0x20d   : > { %2594 = vmatprep.mubr.bf16.mxu1 %v3654_v9  ;;  %v2472_v40 = vpop.f32.mrf.mxu0 }
 0x20e   : > { %v2473_v44 = vadd.f32 %v2472_v40, %v2324_v49 }
 0x214   : > { %3456 = vmatmul.mubr.msk.bf16.gmra.mxu1 %vm2545_vm6, %v3562_v35  ;;  %v2461_v35 = vadd.f32 %v2460_v25, %v2314_v26 }
 0x215   : > { %2669 = vmatprep.mubr.bf16.mxu1 %v3654_v9 }
 0x2cc   : > { %v2586_v62 = vpop.f32.mrf.mxu1 }
 0x2cd   : > { %v2587_v24 = vadd.f32 %v2586_v62, %v2518_v30 }
 0x2ce   : > { %v2588_v28 = vpop.f32.mrf.mxu1 }
 0x2cf   : > { %v2589_v10 = vadd.f32 %v2588_v28, %v2518_v30  ;;  %v2605_v42 = vmax.f32 %v2587_v24, 0.0 }
 0x2d0   : > { %v2590_v15 = vpop.f32.mrf.mxu1 }
 0x2d1   : > { %v2591_v38 = vadd.f32 %v2590_v15, %v2523_v2  ;;  %v2606_v32 = vmax.f32 %v2589_v10, 0.0 }
 0x2d2   : > { %v2592_v34 = vpop.f32.mrf.mxu1 }
 0x2d3   : > { %v2593_v3 = vadd.f32 %v2592_v34, %v2523_v2  ;;  %v2607_v58 = vmax.f32 %v2591_v38, 0.0  ;;  %v2457_v34 = vadd.f32 %v2456_v4, %v2309_v45 }
 0x2d4   : > { %v2596_v59 = vpop.f32.mrf.mxu1 }
 0x2d5   : > { %v2597_v18 = vadd.f32 %v2596_v59, %v2528_v57  ;;  %v2608_v12 = vmax.f32 %v2593_v3, 0.0  ;;  %v2617_v14 = vpack.c.bf16 %v2607_v58, %v2605_v42 }
 0x2d6   : > { %v2598_v1 = vpop.f32.mrf.mxu1 }
 0x2d7   : > { %v2599_v61 = vadd.f32 %v2598_v1, %v2528_v57  ;;  %v2609_v33 = vmax.f32 %v2597_v18, 0.0  ;;  %v2618_v36 = vpack.c.bf16 %v2608_v12, %v2606_v32  ;;  %v3566_v12 = vld [vmem:[%s4859_s6 + $0x8] sm:$0xff]  }
 0x2d8   : > { %v2600_v55 = vpop.f32.mrf.mxu1 }
 0x2d9   : > { %v2601_v0 = vadd.f32 %v2600_v55, %v2533_v50  ;;  %v2610_v39 = vmax.f32 %v2599_v61, 0.0 }
 0x2da   : > { %v2602_v53 = vpop.f32.mrf.mxu1 }
 0x2db   : > { %v2603_v13 = vadd.f32 %v2602_v53, %v2533_v50  ;;  %v2611_v19 = vmax.f32 %v2601_v0, 0.0 }
 0x2dd   : > { %v2612_v46 = vmax.f32 %v2603_v13, 0.0  ;;  %v2619_v56 = vpack.c.bf16 %v2611_v19, %v2609_v33  ;;  %v3565_v19 = vld [vmem:[%s4859_s6] sm:$0xff]   ;;  %v2736_v33 = vpop.permute.xlu1 %2735 }
 0x2df   : > { %v2620_v51 = vpack.c.bf16 %v2612_v46, %v2610_v39 }
 0x2e1   : > { %2649 = vmatprep.subr.bf16.mxu1 %v2620_v51  ;;  %v2731_v51 = vpop.permute.xlu0 %2730 }
 0x2e2   : > { %2650 = vmatpush1.bf16.msra.mxu1 %v2619_v56 }
 0x2e3   : > { %2651 = vmatprep.subr.bf16.mxu1 %v2618_v36  ;;  %v2726_v36 = vpop.permute.xlu1 %2725 }
 0x2e5   : > { %v2721_v4 = vpop.permute.xlu0 %2720 }
 0x2e6   : > { %2652 = vmatpush1.bf16.msra.mxu1 %v2617_v14 }
 0x2e9   : > { %3459 = vmatmul.mubr.msk.bf16.vlgmr.msra.gmra.mxu1 %vm2545_vm6, %v3563_v23 }
 0x2ea   : > { %2679 = vmatprep.mubr.bf16.mxu1 %v3654_v9 }
 0x2f1   : > { %3460 = vmatmul.mubr.msk.bf16.gmra.mxu1 %vm2545_vm6, %v3564_v8 }
 0x2f2   : > { %2786 = vmatprep.mubr.bf16.mxu1 %v3654_v9 }
 0x3a9   : > { %v2671_v60 = vpop.f32.mrf.mxu1 }
 0x3aa   : > { %v2690_v3 = vadd.f32 %v2671_v60, %v2457_v34 }
 0x3ab   : > { %v2673_v29 = vpop.f32.mrf.mxu1 }
 0x3ac   : > { %v2691_v15 = vadd.f32 %v2673_v29, %v2459_v41  ;;  %v2698_v13 = vmax.f32 %v2690_v3, 0.0  ;;  %v3569_v41 = vld [vmem:[%s4861_s8 + $0x10] ss:$0 sps:$4 sm:$0x11]  }
 0x3ad   : > { %v2675_v20 = vpop.f32.mrf.mxu1 }
 0x3ae   : > { %v2692_v57 = vadd.f32 %v2675_v20, %v2461_v35  ;;  %v2699_v0 = vmax.f32 %v2691_v15, 0.0 }
 0x3af   : > { %v2677_v43 = vpop.f32.mrf.mxu1 }
 0x3b0   : > { %v2693_v22 = vadd.f32 %v2677_v43, %v2463_v52  ;;  %v2700_v18 = vmax.f32 %v2692_v57, 0.0 }
 0x3b1   : > { %v2681_v48 = vpop.f32.mrf.mxu1 }
 0x3b2   : > { %v2694_v62 = vadd.f32 %v2681_v48, %v2467_v47  ;;  %v2701_v1 = vmax.f32 %v2693_v22, 0.0  ;;  %v2710_v38 = vpack.c.bf16 %v2700_v18, %v2698_v13  ;;  %v3655_v47 = vmov 0.0  }
 0x3b3   : > { %v2683_v31 = vpop.f32.mrf.mxu1  ;;  %3303 = vst [vmem:[%s4790_s19] sm:$0xe0] %v3655_v47  ;;  %3304 = vst [vmem:[%s4790_s19 + $0x8] sm:$0xe0] %v3655_v47 }
 0x3b4   : > { %v2695_v6 = vadd.f32 %v2683_v31, %v2469_v27  ;;  %v2702_v61 = vmax.f32 %v2694_v62, 0.0  ;;  %v2711_v10 = vpack.c.bf16 %v2701_v1, %v2699_v0  ;;  %v3567_v27 = vld [vmem:[%s4861_s8] sm:$0xff]  }
 0x3b5   : > { %v2685_v16 = vpop.f32.mrf.mxu1 }
 0x3b6   : > { %v2696_v21 = vadd.f32 %v2685_v16, %v2471_v5  ;;  %v2703_v2 = vmax.f32 %v2695_v6, 0.0  ;;  %v3568_v5 = vld [vmem:[%s4861_s8 + $0x8] sm:$0xff]   ;;  %v2842_v16 = vpop.permute.xlu0 %2841 }
 0x3b7   : > { %v2687_v28 = vpop.f32.mrf.mxu1 }
 0x3b8   : > { %v2697_v50 = vadd.f32 %v2687_v28, %v2473_v44  ;;  %v2704_v59 = vmax.f32 %v2696_v21, 0.0 }
 0x3ba   : > { %v2705_v55 = vmax.f32 %v2697_v50, 0.0  ;;  %v2712_v53 = vpack.c.bf16 %v2704_v59, %v2702_v61  ;;  %v2832_v44 = vpop.permute.xlu0 %2831  ;;  %v2847_v50 = vpop.permute.xlu1 %2846 }
 0x3bc   : > { %v2713_v30 = vpack.c.bf16 %v2705_v55, %v2703_v2 }
 0x3be   : > { %2766 = vmatprep.subr.bf16.mxu1 %v2713_v30  ;;  %v4794_v22 = vpop.permute.xlu0 %2328  ;;  %v2837_v2 = vpop.permute.xlu1 %2836 }
 0x3bf   : > { %2767 = vmatpush1.bf16.msra.mxu1 %v2712_v53 }
 0x3c0   : > { %2768 = vmatprep.subr.bf16.mxu1 %v2711_v10 }
 0x3c2   : > { %v4796_v6 = vpop.permute.xlu0 %3074 }
 0x3c3   : > { %2769 = vmatpush1.bf16.msra.mxu1 %v2710_v38 }
 0x3c6   : > { %3463 = vmatmul.mubr.msk.bf16.vlgmr.msra.gmra.mxu1 %vm2545_vm6, %v3565_v19  ;;  %v4798_v62 = vpop.permute.xlu0 %2338 }
 0x3c7   : > { %2796 = vmatprep.mubr.bf16.mxu1 %v3654_v9 }
 0x3ca   : > { %v4800_v57 = vpop.permute.xlu0 %3146 }
 0x3ce   : > { %3464 = vmatmul.mubr.msk.bf16.gmra.mxu1 %vm2545_vm6, %v3566_v12  ;;  %v2852_v18 = vpop.permute.xlu0 %2851 }
 0x3cf   : > { %2908 = vmatprep.mubr.bf16.mxu1 %v3654_v9 }
 0x486   : > { %v2788_v39 = vpop.f32.mrf.mxu1 }
 0x487   : > { %v2789_v11 = vadd.f32 %v2788_v39, %v2721_v4 }
 0x488   : > { %v2790_v46 = vpop.f32.mrf.mxu1 }
 0x489   : > { %v2791_v63 = vadd.f32 %v2790_v46, %v2721_v4  ;;  %v2807_v45 = vmax.f32 %v2789_v11, 0.0  ;;  %v3570_v4 = vld [vmem:[%s4863_s10] sm:$0xff]  }
 0x48a   : > { %v2792_v24 = vpop.f32.mrf.mxu1 }
 0x48b   : > { %v2793_v60 = vadd.f32 %v2792_v24, %v2726_v36  ;;  %v2808_v43 = vmax.f32 %v2791_v63, 0.0 }
 0x48c   : > { %v2794_v32 = vpop.f32.mrf.mxu1 }
 0x48d   : > { %v2795_v14 = vadd.f32 %v2794_v32, %v2726_v36  ;;  %v2809_v26 = vmax.f32 %v2793_v60, 0.0 }
 0x48e   : > { %v2798_v58 = vpop.f32.mrf.mxu1 }
 0x48f   : > { %v2799_v54 = vadd.f32 %v2798_v58, %v2731_v51  ;;  %v2810_v29 = vmax.f32 %v2795_v14, 0.0  ;;  %v2820_v52 = vpack.c.bf16 %v2809_v26, %v2807_v45  ;;  %v3284_v26 = vlaneseq }
 0x490   : > { %v2800_v56 = vpop.f32.mrf.mxu1 }
 0x491   : > { %v2801_v23 = vadd.f32 %v2800_v56, %v2731_v51  ;;  %v2811_v7 = vmax.f32 %v2799_v54, 0.0  ;;  %v2821_v31 = vpack.c.bf16 %v2810_v29, %v2808_v43  ;;  %vm3298_vm12 = vcmp.lt.s32.totalorder %v3284_v26, 256 }
 0x492   : > { %v2802_v42 = vpop.f32.mrf.mxu1 }
 0x493   : > { %v2803_v8 = vadd.f32 %v2802_v42, %v2736_v33  ;;  %v2812_v49 = vmax.f32 %v2801_v23, 0.0 }
 0x494   : > { %v2804_v25 = vpop.f32.mrf.mxu1 }
 0x495   : > { %v2805_v17 = vadd.f32 %v2804_v25, %v2736_v33  ;;  %v2813_v37 = vmax.f32 %v2803_v8, 0.0  ;;  %v3571_v25 = vld [vmem:[%s4863_s10 + $0x8] sm:$0xff]  }
 0x497   : > { %v2814_v20 = vmax.f32 %v2805_v17, 0.0  ;;  %v2822_v40 = vpack.c.bf16 %v2813_v37, %v2811_v7  ;;  %v3656_v7 = vmov 1966171168  }
 0x498   : > { %v3282_v43 = vunpack.c.l.s4 %v3656_v7 }
 0x499   : > { %v2823_v48 = vpack.c.bf16 %v2814_v20, %v2812_v49 }
 0x49b   : > { %2888 = vmatprep.subr.bf16.mxu1 %v2823_v48 }
 0x49c   : > { %2889 = vmatpush1.bf16.msra.mxu1 %v2822_v40 }
 0x49d   : > { %2890 = vmatprep.subr.bf16.mxu1 %v2821_v31 }
 0x4a0   : > { %2891 = vmatpush1.bf16.msra.mxu1 %v2820_v52 }
 0x4a3   : > { %3468 = vmatmul.mubr.msk.bf16.vlgmr.msra.gmra.mxu1 %vm2545_vm6, %v3567_v27 }
 0x4a4   : > { %2918 = vmatprep.mubr.bf16.mxu1 %v3654_v9 }
 0x4ab   : > { %3469 = vmatmul.mubr.msk.bf16.gmra.mxu1 %vm2545_vm6, %v3568_v5 }
 0x4ac   : > { %2928 = vmatprep.mubr.bf16.mxu1 %v3654_v9 }
 0x4b3   : > { %3470 = vmatmul.mubr.msk.bf16.gmra.mxu1 %vm2545_vm6, %v3569_v41  ;;  %v3283_v41 = vunpack.c.0.s8 %v3282_v43 }
 0x4b4   : > { %3123 = vmatprep.mubr.bf16.mxu1 %v3654_v9 }
 0x563   : > { %v2910_v21 = vpop.f32.mrf.mxu1 }
 0x564   : > { %v2911_v51 = vadd.f32 %v2910_v21, %v2832_v44  ;;  %v3285_v21 = vshrl.u32 %v3284_v26, 7  ;;  %v3572_v26 = vld [vmem:[%s4864_s11] sm:$0xff]  }
 0x565   : > { %v2912_v35 = vpop.f32.mrf.mxu1 }
 0x566   : > { %v2913_v13 = vadd.f32 %v2912_v35, %v2832_v44 }
 0x567   : > { %v2914_v28 = vpop.f32.mrf.mxu1 }
 0x568   : > { %v2915_v12 = vadd.f32 %v2914_v28, %v2837_v2 }
 0x569   : > { %v2916_v15 = vpop.f32.mrf.mxu1 }
 0x56a   : > { %v2917_v61 = vadd.f32 %v2916_v15, %v2837_v2  ;;  %v2977_v42 = vpack.c.bf16 %v2915_v12, %v2911_v51 }
 0x56b   : > { %v2920_v34 = vpop.f32.mrf.mxu1 }
 0x56c   : > { %v2921_v53 = vadd.f32 %v2920_v34, %v2842_v16  ;;  %v2978_v24 = vpack.c.bf16 %v2917_v61, %v2913_v13  ;;  %v3286_v34 = vsub.s32 %v3283_v41, %v3285_v21  ;;  %v2476_v61 = vpop.f32.mrf.mxu0 }
 0x56d   : > { %v2922_v59 = vpop.f32.mrf.mxu1 }
 0x56e   : > { %v2923_v0 = vadd.f32 %v2922_v59, %v2842_v16 }
 0x56f   : > { %v2924_v1 = vpop.f32.mrf.mxu1 }
 0x570   : > { %v2925_v55 = vadd.f32 %v2924_v1, %v2847_v50 }
 0x571   : > { %v2926_v3 = vpop.f32.mrf.mxu1 }
 0x572   : > { %v2927_v30 = vadd.f32 %v2926_v3, %v2847_v50  ;;  %v2979_v39 = vpack.c.bf16 %v2925_v55, %v2921_v53 }
 0x573   : > { %v2930_v10 = vpop.f32.mrf.mxu1 }
 0x574   : > { %v2980_v38 = vpack.c.bf16 %v2927_v30, %v2923_v0  ;;  %v4802_v19 = vadd.f32 %v2930_v10, %v2852_v18  ;;  %v2478_v0 = vpop.f32.mrf.mxu0 }
 0x575   : > { %v2932_v46 = vpop.f32.mrf.mxu1 }
 0x576   : > { %v2943_v33 = vand.u32 2147483647, %v4802_v19  ;;  %v2933_v32 = vadd.f32 %v2932_v46, %v2852_v18  ;;  %3009 = vmatprep.subr.bf16.mxu0 %v2980_v38  ;;  %v2937_v5 = vmax.f32 %v4802_v19, 0.0  ;;  %vm2939_vm9 = vcmp.ne.f32.partialorder %v4802_v19, %v4802_v19  ;;  %v2480_v30 = vpop.f32.mrf.mxu0  ;;  %v2334_v38 = vpop.permute.xlu1 %2333 }
 0x577   : > { %3010 = vmatpush1.bf16.msra.mxu0 %v2979_v39  ;;  %v2934_v58 = vpop.f32.mrf.mxu1 }
 0x578   : > { %v2945_v56 = vsub.f32 0.0, %v2943_v33  ;;  %v2944_v36 = vand.u32 2147483647, %v2933_v32  ;;  %3011 = vmatprep.subr.bf16.mxu0 %v2978_v24  ;;  %v2938_v28 = vmax.f32 %v2933_v32, 0.0  ;;  %vm2940_vm10 = vcmp.ne.f32.partialorder %v2933_v32, %v2933_v32  ;;  %v2482_v18 = vpop.f32.mrf.mxu0 }
 0x579   : > { %v2935_v14 = vpop.f32.mrf.mxu1  ;;  %v2479_v24 = vadd.f32 %v2478_v0, %v4794_v22  ;;  %v2483_v58 = vadd.f32 %v2482_v18, %v2334_v38 }
 0x57a   : > { %v2947_v23 = vmul.f32 1.442695, %v2945_v56  ;;  %v2946_v8 = vsub.f32 0.0, %v2944_v36  ;;  %v2486_v53 = vpop.f32.mrf.mxu0  ;;  %v3080_v33 = vpop.permute.xlu1 %3079 }
 0x57b   : > { %3012 = vmatpush1.bf16.msra.mxu0 %v2977_v42 }
 0x57c   : > { %3606 = vpow2.f32 %v2947_v23  ;;  %v2949_v54 = vmul.f32 1.442695, %v2946_v8  ;;  %v2488_v10 = vpop.f32.mrf.mxu0 }
 0x57e   : > { %3608 = vpow2.f32 %v2949_v54  ;;  %3473 = vmatmul.mubr.msk.bf16.vlgmr.msra.gmra.mxu0 %vm2545_vm6, %v3570_v4  ;;  %v2490_v13 = vpop.f32.mrf.mxu0 }
 0x57f   : > { %3039 = vmatprep.mubr.bf16.mxu0 %v3654_v9 }
 0x580   : > { %v2492_v12 = vpop.f32.mrf.mxu0 }
 0x586   : > { %3474 = vmatmul.mubr.msk.bf16.gmra.mxu0 %vm2545_vm6, %v3571_v25 }
 0x587   : > { %3194 = vmatprep.mubr.bf16.mxu0 %v3654_v9 }
 0x589   : > { %v3607_v63 = vpop.eup %3606 }
 0x58a   : > { %v2951_v17 = vadd.f32 1.0, %v3607_v63  ;;  %v2954_v29 = vmul.f32 -0.5, %v3607_v63  ;;  %v2957_v11 = vand.u32 2147483647, %v3607_v63 }
 0x58b   : > { %v3609_v60 = vpop.eup %3608 }
 0x58c   : > { %3610 = vlog2.f32 %v2951_v17  ;;  %v2960_v37 = vadd.f32 1.0, %v3609_v60  ;;  %v2963_v49 = vmul.f32 -0.5, %v3609_v60  ;;  %v2955_v20 = vadd.f32 1.0, %v2954_v29 }
 0x58d   : > { %v2966_v31 = vand.u32 2147483647, %v3609_v60  ;;  %vm2958_vm7 = vcmp.lt.f32.partialorder %v2957_v11, 0.0004427343 }
 0x58e   : > { %3612 = vlog2.f32 %v2960_v37  ;;  %v2964_v48 = vadd.f32 1.0, %v2963_v49  ;;  %v2956_v52 = vmul.f32 %v3607_v63, %v2955_v20  ;;  %v2344_v63 = vpop.permute.xlu1 %2343  ;;  %v2489_v37 = vadd.f32 %v2488_v10, %v4798_v62 }
 0x58f   : > { %vm2967_vm8 = vcmp.lt.f32.partialorder %v2966_v31, 0.0004427343  ;;  %v2491_v29 = vadd.f32 %v2490_v13, %v2344_v63  ;;  %v2493_v7 = vadd.f32 %v2492_v12, %v2344_v63 }
 0x590   : > { %v2965_v44 = vmul.f32 %v3609_v60, %v2964_v48 }
 0x592   : > { %v3152_v18 = vpop.permute.xlu1 %3151 }
 0x599   : > { %v3611_v40 = vpop.eup %3610 }
 0x59a   : > { %v2953_v45 = vmul.f32 0.6931472, %v3611_v40 }
 0x59b   : > { %v3613_v27 = vpop.eup %3612 }
 0x59c   : > { %v2959_v47 = vsel %vm2958_vm7, %v2956_v52, %v2953_v45  ;;  %v2962_v16 = vmul.f32 0.6931472, %v3613_v27 }
 0x59d   : > { %v2969_v35 = vadd.f32 %v2959_v47, %v2937_v5 }
 0x59e   : > { %v2968_v15 = vsel %vm2967_vm8, %v2965_v44, %v2962_v16 }
 0x59f   : > { %v2970_v50 = vadd.f32 %v2968_v15, %v2938_v28  ;;  %v2971_v59 = vsel %vm2939_vm9, %v4802_v19, %v2969_v35  ;;  %v2481_v19 = vadd.f32 %v2480_v30, %v2334_v38 }
 0x5a1   : > { %v2972_v1 = vsel %vm2940_vm10, %v2933_v32, %v2970_v50  ;;  %v2477_v32 = vadd.f32 %v2476_v61, %v4794_v22  ;;  %v2487_v22 = vadd.f32 %v2486_v53, %v4798_v62  ;;  %v3573_v61 = vld [vmem:[%s4866_s13] sm:$0xff]  }
 0x5a2   : > { %v3280_v2 = vcombine.low %v2971_v59, %v2972_v1 }
 0x5a4   : > { %v3287_v55 = vrot.slane %v3280_v2, %v3286_v34 }
 0x5a6   : > { %v3294_v3 = vrot.slane %v3287_v55, %v3286_v34 }
 0x5a8   : > { %3482 = vst.msk [vmem:[%s4790_s19 + $0x4] ss:$8 sm:$0x3] %vm3298_vm12, %v3294_v3 }
 0x63e   : > { %v3031_v39 = vpop.f32.mrf.mxu0 }
 0x63f   : > { %v3050_v42 = vadd.f32 %v3031_v39, %v2477_v32 }
 0x640   : > { %v3033_v46 = vpop.f32.mrf.mxu0 }
 0x641   : > { %v3051_v56 = vadd.f32 %v3033_v46, %v2479_v24  ;;  %v3058_v17 = vmax.f32 %v3050_v42, 0.0 }
 0x642   : > { %v3035_v51 = vpop.f32.mrf.mxu0 }
 0x643   : > { %v3052_v36 = vadd.f32 %v3035_v51, %v2481_v19  ;;  %v3059_v54 = vmax.f32 %v3051_v56, 0.0  ;;  %v3209_v51 = vld [vmem:[%s4868_s15] sm:$0x3] }
 0x644   : > { %v3037_v14 = vpop.f32.mrf.mxu0 }
 0x645   : > { %v3053_v23 = vadd.f32 %v3037_v14, %v2483_v58  ;;  %v3060_v8 = vmax.f32 %v3052_v36, 0.0  ;;  %v3218_v58 = vpop.permute.xlu1 %3217 }
 0x646   : > { %v3041_v4 = vpop.f32.mrf.mxu0 }
 0x647   : > { %v3061_v25 = vmax.f32 %v3053_v23, 0.0  ;;  %v3068_v20 = vpack.c.bf16 %v3060_v8, %v3058_v17  ;;  %v3054_v40 = vadd.f32 %v3041_v4, %v2487_v22 }
 0x648   : > { %v3043_v60 = vpop.f32.mrf.mxu0 }
 0x649   : > { %v3069_v49 = vpack.c.bf16 %v3061_v25, %v3059_v54  ;;  %v3055_v43 = vadd.f32 %v3043_v60, %v2489_v37  ;;  %v3062_v62 = vmax.f32 %v3054_v40, 0.0 }
 0x64a   : > { %v3045_v11 = vpop.f32.mrf.mxu0 }
 0x64b   : > { %v3056_v48 = vadd.f32 %v3045_v11, %v2491_v29  ;;  %3105 = vmatprep.subr.bf16.mxu1 %v3069_v49  ;;  %v3063_v27 = vmax.f32 %v3055_v43, 0.0 }
 0x64c   : > { %v3047_v31 = vpop.f32.mrf.mxu0  ;;  %3106 = vmatpush1.bf16.msra.mxu1 %v3068_v20 }
 0x64d   : > { %v3057_v45 = vadd.f32 %v3047_v31, %v2493_v7  ;;  %v3064_v52 = vmax.f32 %v3056_v48, 0.0 }
 0x64f   : > { %v3065_v5 = vmax.f32 %v3057_v45, 0.0  ;;  %3476 = vmatmul.mubr.msk.bf16.vlgmr.msra.gmra.mxu1 %vm3087_vm11, %v3572_v26  ;;  %v3212_v47 = vpack.c.bf16 %v3064_v52, %v3062_v62 }
 0x650   : > { %3255 = vmatprep.mubr.bf16.mxu1 %v3654_v9 }
 0x651   : > { %v3213_v41 = vpack.c.bf16 %v3065_v5, %v3063_v27 }
 0x653   : > { %3235 = vmatprep.subr.bf16.mxu1 %v3213_v41 }
 0x654   : > { %3236 = vmatpush1.bf16.msra.mxu1 %v3212_v47 }
 0x70f   : > { %v3125_v16 = vpop.f32.mrf.mxu1 }
 0x710   : > { %v3126_v15 = vadd.f32 %v3125_v16, %v4796_v6 }
 0x711   : > { %v3127_v44 = vpop.f32.mrf.mxu1 }
 0x712   : > { %v3128_v35 = vadd.f32 %v3127_v44, %v4796_v6  ;;  %v3134_v55 = vmax.f32 %v3126_v15, 0.0 }
 0x713   : > { %v3129_v21 = vpop.f32.mrf.mxu1 }
 0x714   : > { %v3130_v28 = vadd.f32 %v3129_v21, %v3080_v33  ;;  %v3135_v1 = vmax.f32 %v3128_v35, 0.0 }
 0x715   : > { %v3131_v50 = vpop.f32.mrf.mxu1 }
 0x716   : > { %v3132_v34 = vadd.f32 %v3131_v50, %v3080_v33  ;;  %v3136_v59 = vmax.f32 %v3130_v28, 0.0 }
 0x718   : > { %v3137_v2 = vmax.f32 %v3132_v34, 0.0  ;;  %v3140_v9 = vpack.c.bf16 %v3136_v59, %v3134_v55 }
 0x71a   : > { %v3141_v3 = vpack.c.bf16 %v3137_v2, %v3135_v1 }
 0x71c   : > { %3176 = vmatprep.subr.bf16.mxu0 %v3141_v3 }
 0x71d   : > { %3177 = vmatpush1.bf16.msra.mxu0 %v3140_v9 }
 0x720   : > { %3478 = vmatmul.mubr.msk.bf16.vlgmr.msra.gmra.mxu0 %vm3087_vm11, %v3573_v61 }
 0x7e0   : > { %v3196_v0 = vpop.f32.mrf.mxu0 }
 0x7e1   : > { %v3197_v13 = vadd.f32 %v3196_v0, %v4800_v57 }
 0x7e2   : > { %v3198_v30 = vpop.f32.mrf.mxu0 }
 0x7e3   : > { %v3199_v53 = vadd.f32 %v3198_v30, %v4800_v57  ;;  %v3205_v19 = vmax.f32 %v3197_v13, 0.0 }
 0x7e4   : > { %v3200_v6 = vpop.f32.mrf.mxu0 }
 0x7e5   : > { %v3201_v10 = vadd.f32 %v3200_v6, %v3152_v18  ;;  %v3206_v46 = vmax.f32 %v3199_v53, 0.0 }
 0x7e6   : > { %v3202_v38 = vpop.f32.mrf.mxu0 }
 0x7e7   : > { %v3203_v12 = vadd.f32 %v3202_v38, %v3152_v18  ;;  %v3207_v39 = vmax.f32 %v3201_v10, 0.0 }
 0x7e9   : > { %v3208_v24 = vmax.f32 %v3203_v12, 0.0  ;;  %v3210_v32 = vpack.c.bf16 %v3207_v39, %v3205_v19 }
 0x7eb   : > { %v3211_v33 = vpack.c.bf16 %v3208_v24, %v3206_v46 }
 0x7ed   : > { %3237 = vmatprep.subr.bf16.mxu1 %v3211_v33 }
 0x7ee   : > { %3238 = vmatpush1.bf16.msra.mxu1 %v3210_v32 }
 0x7f1   : > { %3479 = vmatmul.mubr.msk.bf16.vlgmr.msra.gmra.mxu1 %vm2545_vm6, %v3209_v51 }
 0x8b1   : > { %v3257_v56 = vpop.f32.mrf.mxu1 }
 0x8b2   : > { %v3258_v36 = vadd.f32 %v3257_v56, %v3218_v58 }
 0x8b3   : > { %v3259_v57 = vpop.f32.mrf.mxu1 }
 0x8b4   : > { %v3480_v42 = vmul.f32 -1.442695, %v3258_v36  ;;  %v3260_v14 = vadd.f32 %v3259_v57, %v3218_v58 }
 0x8b5   : > { %v3261_v23 = vpop.f32.mrf.mxu1 }
 0x8b6   : > { %3614 = vpow2.f32 %v3480_v42  ;;  %v3481_v8 = vmul.f32 -1.442695, %v3260_v14 }
 0x8b7   : > { %v3262_v4 = vpop.f32.mrf.mxu1 }
 0x8b8   : > { %3616 = vpow2.f32 %v3481_v8 }
 0x8c3   : > { %v3615_v54 = vpop.eup %3614 }
 0x8c4   : > { %v3270_v25 = vadd.f32 1.0, %v3615_v54 }
 0x8c5   : > { %v3617_v63 = vpop.eup %3616 }
 0x8c6   : > { %3618 = vrcp.f32 %v3270_v25  ;;  %v3271_v17 = vadd.f32 1.0, %v3617_v63 }
 0x8c8   : > { %3620 = vrcp.f32 %v3271_v17 }
 0x8d3   : > { %v3619_v60 = vpop.eup %3618 }
 0x8d4   : > { %3276 = vst [vmem:[%s4790_s19] sm:$0xf] %v3619_v60 }
 0x8d5   : > { %v3621_v37 = vpop.eup %3620 }
 0x8d6   : > { %3277 = vst [vmem:[%s4790_s19 + $0x8] sm:$0xf] %v3621_v37 }
 0x8d7 PF: > { %p24_p9 = scmp.ge.s32.totalorder %s3764_s28, 4   ;;  %s4892_s24 = smov %s3642_s25 }
 0x8d8   : > { %s4893_s25 = smov %s3773_s30  ;;  %s4894_s26 = smov %s3764_s28 }
 0x8d9   :  { %26 = sbr.rel (!%p24_p9) target bundleno = 5 (0x5), region = 147 }

</bundles_post_ra>
